<compile_context>
chip_gen: v7x
topology: tpu7x:2x2x1
jax: 0.10.0
libtpu: 0.0.40
codegen_flags: <defaults>
</compile_context>

<pallas_src>
import functools
import math

import jax
import jax.numpy as jnp
from jax import lax
from jax.experimental import pallas as pl
from jax.experimental.pallas import tpu as pltpu

EPS_LN = 1e-5       # LayerNorm eps for float32 inputs
EPS_L2 = 1e-12      # F.normalize eps


def _layernorm(t, g):
    # LayerNorm(dim): unbiased=False variance, gain only, no bias.
    m = jnp.mean(t, axis=-1, keepdims=True)
    v = jnp.mean((t - m) ** 2, axis=-1, keepdims=True)
    return (t - m) * lax.rsqrt(v + EPS_LN) * g


def simple_attention_kernel(x_ref, wq_ref, wkv_ref, wo_ref, g1_ref, g2_ref,
                            o_ref, k_scr, v_scr,
                            *, heads, dim_head, scale, approx_recip):
    f32 = jnp.float32
    qi = pl.program_id(1)
    tq = o_ref.shape[1]
    sqrt_scale = math.sqrt(scale)
    eps2 = EPS_L2 * EPS_L2
    g1 = g1_ref[...]                                                      # (1, D)

    # ---- K/V cache: built once per batch element (qi == 0), reused for qi > 0 ----
    @pl.when(qi == 0)
    def _build_kv_cache():
        xnf = _layernorm(x_ref[0], g1)                                    # (N, D) f32
        kv = jnp.dot(xnf, wkv_ref[...], preferred_element_type=f32)       # one 128-wide matmul
        k = kv[:, :dim_head]                                              # (N, Dh)
        v = kv[:, dim_head:]                                              # (N, Dh)
        # l2norm(k) * sqrt(scale): rsqrt(max(ss, eps^2)) == 1 / max(||k||, eps)
        k_ss = jnp.sum(k * k, axis=-1, keepdims=True)
        k = k * (lax.rsqrt(jnp.maximum(k_ss, eps2)) * sqrt_scale)
        k_scr[...] = k.astype(k_scr.dtype)                                # cached pre-scaled
        v_scr[...] = v.astype(v_scr.dtype)

    # ---- query tile: LayerNorm + one (Tq, D) @ (D, H*Dh) projection ----
    row0 = pl.multiple_of(qi * tq, tq)
    xq = x_ref[0, pl.ds(row0, tq), :]                                     # (Tq, D)
    xnq = _layernorm(xq, g1)
    q = jnp.dot(xnq, wq_ref[...], preferred_element_type=f32) * scale     # (Tq, H*Dh)

    # fold heads into the matmul M dimension (head-major rows); per-row l2norm is per (head, query)
    q_heads = jnp.concatenate(
        [q[:, h * dim_head:(h + 1) * dim_head] for h in range(heads)], axis=0)   # (H*Tq, Dh)
    q_ss = jnp.sum(q_heads * q_heads, axis=-1, keepdims=True)
    q_heads = q_heads * (lax.rsqrt(jnp.maximum(q_ss, eps2)) * sqrt_scale)

    kc = k_scr[...]                                                       # (N, Dh) attn dtype
    vc = v_scr[...]                                                       # (N, Dh) attn dtype
    # sim = Q K^T: one (H*Tq, Dh) x (Dh, N) MXU matmul, K shared across heads (no broadcast)
    sim = lax.dot_general(q_heads.astype(kc.dtype), kc,
                          (((1,), (1,)), ((), ())),
                          preferred_element_type=f32)                     # (H*Tq, N) f32

    # ---- softmax with deferred normalization ----
    m = jnp.max(sim, axis=-1, keepdims=True)
    e = jnp.exp(sim - m)                                                  # f32 on the EUP
    l = jnp.sum(e, axis=-1, keepdims=True)
    pv = jnp.dot(e.astype(vc.dtype), vc, preferred_element_type=f32)      # (H*Tq, Dh) f32
    pv = pv * pl.reciprocal(l, approx=approx_recip)                       # normalize after PV
    # dropout(p=0.0) is the identity.

    # ---- merge heads back into lanes -> single (Tq, H*Dh) @ (H*Dh, D) output projection ----
    out = jnp.concatenate(
        [pv[h * tq:(h + 1) * tq, :] for h in range(heads)], axis=1)       # (Tq, H*Dh)
    y = jnp.dot(out, wo_ref[...], preferred_element_type=f32)             # (Tq, D)

    o_ref[0] = _layernorm(y, g2_ref[...])


def _vmem_capacity_bytes():
    try:
        info = pltpu.get_tpu_info()
        cap = int(getattr(info, "vmem_capacity_bytes", 0))
        if cap > 0:
            return cap
    except Exception:
        pass
    return 64 * 1024 * 1024    # conservative fallback (v7x per-core VMEM)


def _vmem_estimate(n, tq, heads, dim_head, d_model, attn_bytes):
    inner = heads * dim_head
    rows = heads * tq
    return int(
        2 * n * d_model * 4                                  # x block (double-buffered, f32)
        + 2 * n * dim_head * attn_bytes                      # cached K / V
        + 2 * (d_model * inner + d_model * 2 * dim_head
               + inner * d_model + 2 * d_model) * 4          # weights + gains
        + 2 * 2 * tq * d_model * 4                           # output block + LN temporaries
        + rows * n * (4 + 4 + attn_bytes)                    # sim + exp (f32) + attn-dtype copy
        + rows * dim_head * 4 * 3                            # q_heads / pv / normalized pv
        + tq * inner * 4 * 3                                 # q projection / merged out / temps
        + n * (d_model + 2 * dim_head) * 4                   # qi==0: LayerNorm(x) + kv temporaries
    )


def _pick_q_tile(n, heads, dim_head, d_model, attn_bytes, vmem_cap):
    budget = int(vmem_cap * 0.55)   # headroom for Mosaic internal scratch / pipelining
    candidates = [t for t in (1024, 512, 256, 128, 64, 32, 16, 8) if t <= n and n % t == 0]
    if not candidates:
        return n
    for t in candidates:
        if _vmem_estimate(n, t, heads, dim_head, d_model, attn_bytes) <= budget:
            return t
    return candidates[-1]


def simple_attention(x, wq, wkv, wo, g1, g2, *, heads, dim_head, scale=16.0,
                     attn_dtype=jnp.bfloat16, q_tile=None):
    B, N, D = x.shape
    inner = heads * dim_head
    assert wq.shape == (D, inner)
    assert wkv.shape == (D, 2 * dim_head)
    assert wo.shape == (inner, D)

    attn_dtype = jnp.dtype(attn_dtype)
    attn_bytes = attn_dtype.itemsize
    g1 = g1.reshape(1, D)
    g2 = g2.reshape(1, D)

    vmem_cap = _vmem_capacity_bytes()
    tq = q_tile if q_tile is not None else _pick_q_tile(N, heads, dim_head, D, attn_bytes, vmem_cap)
    assert N % tq == 0 and (tq == N or tq % 8 == 0), "q tile must divide N (mult. of 8)"
    n_qt = N // tq

    est = _vmem_estimate(N, tq, heads, dim_head, D, attn_bytes)
    vmem_limit = int(min(0.9 * vmem_cap, max(32 * 1024 * 1024, 1.4 * est)))

    kernel = functools.partial(
        simple_attention_kernel,
        heads=heads, dim_head=dim_head, scale=scale,
        approx_recip=(attn_dtype != jnp.dtype(jnp.float32)))

    return pl.pallas_call(
        kernel,
        out_shape=jax.ShapeDtypeStruct((B, N, D), jnp.float32),
        grid_spec=pltpu.PrefetchScalarGridSpec(
            num_scalar_prefetch=0,
            grid=(B, n_qt),
            in_specs=[
                pl.BlockSpec((1, N, D), lambda b, qi: (b, 0, 0)),        # x (full seq; q tiles sliced in-kernel)
                pl.BlockSpec((D, inner), lambda b, qi: (0, 0)),          # wq
                pl.BlockSpec((D, 2 * dim_head), lambda b, qi: (0, 0)),   # wkv
                pl.BlockSpec((inner, D), lambda b, qi: (0, 0)),          # wo
                pl.BlockSpec((1, D), lambda b, qi: (0, 0)),              # pre-norm gain
                pl.BlockSpec((1, D), lambda b, qi: (0, 0)),              # post-norm gain
            ],
            out_specs=pl.BlockSpec((1, tq, D), lambda b, qi: (b, qi, 0)),
            scratch_shapes=[
                pltpu.VMEM((N, dim_head), attn_dtype),   # cached K (l2-normed * sqrt(scale))
                pltpu.VMEM((N, dim_head), attn_dtype),   # cached V
            ],
        ),
        compiler_params=pltpu.CompilerParams(
            # qi carries the K/V cache -> "arbitrary"; batch axis stays "parallel" (megacore).
            dimension_semantics=("parallel", "arbitrary"),
            vmem_limit_bytes=vmem_limit),
    )(x, wq, wkv, wo, g1, g2)


def reference(x, wq, wkv, wo, g1, g2, *, heads, dim_head, scale=16.0):
    """Pure-JAX reference mirroring the PyTorch forward exactly (f32, mask=None)."""
    def ln(t, g):
        m = jnp.mean(t, -1, keepdims=True)
        v = jnp.mean((t - m) ** 2, -1, keepdims=True)
        return (t - m) * lax.rsqrt(v + EPS_LN) * g

    def l2n(t):
        n = jnp.linalg.norm(t, axis=-1, keepdims=True)
        return t / jnp.maximum(n, EPS_L2)

    B, N, _ = x.shape
    xn = ln(x, g1)
    q = xn @ wq
    kv = xn @ wkv
    k, v = kv[..., :dim_head], kv[..., dim_head:]
    q = q.reshape(B, N, heads, dim_head).transpose(0, 2, 1, 3)
    q = q * scale
    q = l2n(q) * math.sqrt(scale)
    k = l2n(k) * math.sqrt(scale)
    sim = jnp.einsum('bhid,bjd->bhij', q, k)
    attn = jax.nn.softmax(sim.astype(jnp.float32), axis=-1).astype(sim.dtype)
    out = jnp.einsum('bhij,bjd->bhid', attn, v)
    out = out.transpose(0, 2, 1, 3).reshape(B, N, heads * dim_head)
    return ln(out @ wo, g2)


if __name__ == "__main__":
    # Small, module-consistent, lane-friendly shapes (module defaults: heads=8, dim_head=64).
    B, N, D = 2, 16, 128
    heads, dim_head = 8, 64
    inner = heads * dim_head
    scale = 16.0   # cosine_sim=True -> scale = cosine_sim_scale

    key = jax.random.PRNGKey(0)
    kx, kq, kkv, ko = jax.random.split(key, 4)

    x = jax.random.normal(kx, (B, N, D), dtype=jnp.float32)
    wq = jax.random.normal(kq, (D, inner), dtype=jnp.float32) / math.sqrt(D)
    wkv = jax.random.normal(kkv, (D, 2 * dim_head), dtype=jnp.float32) / math.sqrt(D)
    wo = jax.random.normal(ko, (inner, D), dtype=jnp.float32) / math.sqrt(inner)
    g1 = jnp.ones((D,), dtype=jnp.float32)   # LayerNorm gains init to 1 (as in PyTorch)
    g2 = jnp.ones((D,), dtype=jnp.float32)

    ref = reference(x, wq, wkv, wo, g1, g2, heads=heads, dim_head=dim_head, scale=scale)

    # 1) Exactness check: f32 attention matmuls + exact reciprocal; q_tile=8 exercises the
    #    query-tiling AND the K/V cache reuse path (qi > 0).
    out_f32 = simple_attention(x, wq, wkv, wo, g1, g2, heads=heads, dim_head=dim_head,
                               scale=scale, attn_dtype=jnp.float32, q_tile=8)
    out_f32 = jax.block_until_ready(out_f32)
    assert out_f32.shape == (B, N, D)
    assert jnp.allclose(out_f32, ref, rtol=2e-3, atol=2e-3), \
        f"f32 path max abs err = {jnp.max(jnp.abs(out_f32 - ref))}"

    # 2) Fast path: bf16 MXU operands (f32 accumulation), bf16 K/V cache, approx softmax
    #    reciprocal, auto (VMEM-aware) query tile.
    out_bf16 = simple_attention(x, wq, wkv, wo, g1, g2, heads=heads, dim_head=dim_head,
                                scale=scale)
    out_bf16 = jax.block_until_ready(out_bf16)
    assert out_bf16.shape == (B, N, D)
    assert jnp.allclose(out_bf16, ref, rtol=5e-2, atol=5e-2), \
        f"bf16 path max abs err = {jnp.max(jnp.abs(out_bf16 - ref))}"

    print("KERNEL_OK")
</pallas_src>

<mosaic_0001>
module attributes {stable_mosaic.version = 11 : i64} {
  func.func @simple_attention_kernel(%arg0: i32, %arg1: i32, %arg2: memref<1x16x128xf32, #tpu.memory_space<vmem>>, %arg3: memref<128x512xf32, #tpu.memory_space<vmem>>, %arg4: memref<128x128xf32, #tpu.memory_space<vmem>>, %arg5: memref<512x128xf32, #tpu.memory_space<vmem>>, %arg6: memref<1x128xf32, #tpu.memory_space<vmem>>, %arg7: memref<1x128xf32, #tpu.memory_space<vmem>>, %arg8: memref<1x8x128xf32, #tpu.memory_space<vmem>>, %arg9: memref<16x64xf32, #tpu.memory_space<vmem>>, %arg10: memref<16x64xf32, #tpu.memory_space<vmem>>) attributes {dimension_semantics = [#tpu.dimension_semantics<parallel>, #tpu.dimension_semantics<arbitrary>], iteration_bounds = array<i64: 2, 2>, scalar_prefetch = 0 : i64, scratch_operands = 2 : i64, tpu.core_type = #tpu.core_type<tc>, window_params = [{transform_indices = @transform_0, window_bounds = array<i64: 1, 16, 128>}, {pipeline_mode = #tpu.pipeline_mode<synchronous>, transform_indices = @transform_1, window_bounds = array<i64: 128, 512>}, {pipeline_mode = #tpu.pipeline_mode<synchronous>, transform_indices = @transform_2, window_bounds = array<i64: 128, 128>}, {pipeline_mode = #tpu.pipeline_mode<synchronous>, transform_indices = @transform_3, window_bounds = array<i64: 512, 128>}, {pipeline_mode = #tpu.pipeline_mode<synchronous>, transform_indices = @transform_4, window_bounds = array<i64: 1, 128>}, {pipeline_mode = #tpu.pipeline_mode<synchronous>, transform_indices = @transform_5, window_bounds = array<i64: 1, 128>}, {transform_indices = @transform_6, window_bounds = array<i64: 1, 8, 128>}]} {
    %c0 = arith.constant 0 : index
    %c0_0 = arith.constant 0 : index
    %0 = vector.load %arg6[%c0, %c0_0] : memref<1x128xf32, #tpu.memory_space<vmem>>, vector<1x128xf32>
    %c0_i32 = arith.constant 0 : i32
    %1 = arith.cmpi eq, %arg1, %c0_i32 : i32
    %2 = arith.extui %1 : i1 to i32
    %c0_i32_1 = arith.constant 0 : i32
    %3 = arith.cmpi ne, %2, %c0_i32_1 : i32
    scf.if %3 {
      %c0_36 = arith.constant 0 : index
      %c0_37 = arith.constant 0 : index
      %c0_38 = arith.constant 0 : index
      %101 = vector.load %arg2[%c0_36, %c0_37, %c0_38] : memref<1x16x128xf32, #tpu.memory_space<vmem>>, vector<1x16x128xf32>
      %102 = vector.shape_cast %101 : vector<1x16x128xf32> to vector<16x128xf32>
      %cst_39 = arith.constant dense<0.000000e+00> : vector<16xf32>
      %103 = vector.multi_reduction <add>, %102, %cst_39 [1] : vector<16x128xf32> to vector<16xf32>
      %104 = vector.shape_cast %103 : vector<16xf32> to vector<16x1xf32>
      %cst_40 = arith.constant 1.280000e+02 : f32
      %105 = vector.broadcast %cst_40 : f32 to vector<16x1xf32>
      %106 = arith.divf %104, %105 : vector<16x1xf32>
      %107 = vector.broadcast %106 : vector<16x1xf32> to vector<16x128xf32>
      %108 = arith.subf %102, %107 : vector<16x128xf32>
      %109 = arith.mulf %108, %108 : vector<16x128xf32>
      %cst_41 = arith.constant dense<0.000000e+00> : vector<16xf32>
      %110 = vector.multi_reduction <add>, %109, %cst_41 [1] : vector<16x128xf32> to vector<16xf32>
      %111 = vector.shape_cast %110 : vector<16xf32> to vector<16x1xf32>
      %cst_42 = arith.constant 1.280000e+02 : f32
      %112 = vector.broadcast %cst_42 : f32 to vector<16x1xf32>
      %113 = arith.divf %111, %112 : vector<16x1xf32>
      %114 = vector.broadcast %106 : vector<16x1xf32> to vector<16x128xf32>
      %115 = arith.subf %102, %114 : vector<16x128xf32>
      %cst_43 = arith.constant 9.99999974E-6 : f32
      %116 = vector.broadcast %cst_43 : f32 to vector<16x1xf32>
      %117 = arith.addf %113, %116 : vector<16x1xf32>
      %118 = math.rsqrt %117 : vector<16x1xf32>
      %119 = vector.broadcast %118 : vector<16x1xf32> to vector<16x128xf32>
      %120 = arith.mulf %115, %119 : vector<16x128xf32>
      %121 = vector.broadcast %0 : vector<1x128xf32> to vector<16x128xf32>
      %122 = arith.mulf %120, %121 : vector<16x128xf32>
      %c0_44 = arith.constant 0 : index
      %c0_45 = arith.constant 0 : index
      %123 = vector.load %arg4[%c0_44, %c0_45] : memref<128x128xf32, #tpu.memory_space<vmem>>, vector<128x128xf32>
      %cst_46 = arith.constant dense<0.000000e+00> : vector<16x128xf32>
      %124 = tpu.matmul %122, %123, %cst_46 {dimension_numbers = #tpu.dot_dimension_numbers<[1], [0], [0], [1], [0, 0, 1, 1], [], []>} : vector<16x128xf32>, vector<128x128xf32>, vector<16x128xf32> -> vector<16x128xf32>
      %125 = vector.extract_strided_slice %124 {offsets = [0, 0], sizes = [16, 64], strides = [1, 1]} : vector<16x128xf32> to vector<16x64xf32>
      %126 = vector.extract_strided_slice %124 {offsets = [0, 64], sizes = [16, 64], strides = [1, 1]} : vector<16x128xf32> to vector<16x64xf32>
      %127 = arith.mulf %125, %125 : vector<16x64xf32>
      %cst_47 = arith.constant dense<0.000000e+00> : vector<16xf32>
      %128 = vector.multi_reduction <add>, %127, %cst_47 [1] : vector<16x64xf32> to vector<16xf32>
      %129 = vector.shape_cast %128 : vector<16xf32> to vector<16x1xf32>
      %cst_48 = arith.constant 1.000000e-24 : f32
      %130 = vector.broadcast %cst_48 : f32 to vector<16x1xf32>
      %131 = arith.maximumf %129, %130 : vector<16x1xf32>
      %132 = math.rsqrt %131 : vector<16x1xf32>
      %cst_49 = arith.constant 4.000000e+00 : f32
      %133 = vector.broadcast %cst_49 : f32 to vector<16x1xf32>
      %134 = arith.mulf %132, %133 : vector<16x1xf32>
      %135 = vector.broadcast %134 : vector<16x1xf32> to vector<16x64xf32>
      %136 = arith.mulf %125, %135 : vector<16x64xf32>
      %c0_50 = arith.constant 0 : index
      %c0_51 = arith.constant 0 : index
      %137 = vector.load %arg9[%c0_50, %c0_51] : memref<16x64xf32, #tpu.memory_space<vmem>>, vector<16x64xf32>
      tpu.vector_store %arg9[%c0_50, %c0_51], %136 {strides = array<i32>} : memref<16x64xf32, #tpu.memory_space<vmem>>, vector<16x64xf32>,
      %c0_52 = arith.constant 0 : index
      %c0_53 = arith.constant 0 : index
      %138 = vector.load %arg10[%c0_52, %c0_53] : memref<16x64xf32, #tpu.memory_space<vmem>>, vector<16x64xf32>
      tpu.vector_store %arg10[%c0_52, %c0_53], %126 {strides = array<i32>} : memref<16x64xf32, #tpu.memory_space<vmem>>, vector<16x64xf32>,
    } else {
    }
    %c8_i32 = arith.constant 8 : i32
    %4 = arith.muli %arg1, %c8_i32 : i32
    %5 = tpu.assume_multiple %4, 8 : i32
    %c0_2 = arith.constant 0 : index
    %6 = arith.index_cast %5 : i32 to index
    %c0_3 = arith.constant 0 : index
    %7 = vector.load %arg2[%c0_2, %6, %c0_3] : memref<1x16x128xf32, #tpu.memory_space<vmem>>, vector<1x8x128xf32>
    %8 = vector.shape_cast %7 : vector<1x8x128xf32> to vector<8x128xf32>
    %cst = arith.constant dense<0.000000e+00> : vector<8xf32>
    %9 = vector.multi_reduction <add>, %8, %cst [1] : vector<8x128xf32> to vector<8xf32>
    %10 = vector.shape_cast %9 : vector<8xf32> to vector<8x1xf32>
    %cst_4 = arith.constant 1.280000e+02 : f32
    %11 = vector.broadcast %cst_4 : f32 to vector<8x1xf32>
    %12 = arith.divf %10, %11 : vector<8x1xf32>
    %13 = vector.broadcast %12 : vector<8x1xf32> to vector<8x128xf32>
    %14 = arith.subf %8, %13 : vector<8x128xf32>
    %15 = arith.mulf %14, %14 : vector<8x128xf32>
    %cst_5 = arith.constant dense<0.000000e+00> : vector<8xf32>
    %16 = vector.multi_reduction <add>, %15, %cst_5 [1] : vector<8x128xf32> to vector<8xf32>
    %17 = vector.shape_cast %16 : vector<8xf32> to vector<8x1xf32>
    %cst_6 = arith.constant 1.280000e+02 : f32
    %18 = vector.broadcast %cst_6 : f32 to vector<8x1xf32>
    %19 = arith.divf %17, %18 : vector<8x1xf32>
    %20 = vector.broadcast %12 : vector<8x1xf32> to vector<8x128xf32>
    %21 = arith.subf %8, %20 : vector<8x128xf32>
    %cst_7 = arith.constant 9.99999974E-6 : f32
    %22 = vector.broadcast %cst_7 : f32 to vector<8x1xf32>
    %23 = arith.addf %19, %22 : vector<8x1xf32>
    %24 = math.rsqrt %23 : vector<8x1xf32>
    %25 = vector.broadcast %24 : vector<8x1xf32> to vector<8x128xf32>
    %26 = arith.mulf %21, %25 : vector<8x128xf32>
    %27 = vector.broadcast %0 : vector<1x128xf32> to vector<8x128xf32>
    %28 = arith.mulf %26, %27 : vector<8x128xf32>
    %c0_8 = arith.constant 0 : index
    %c0_9 = arith.constant 0 : index
    %29 = vector.load %arg3[%c0_8, %c0_9] : memref<128x512xf32, #tpu.memory_space<vmem>>, vector<128x512xf32>
    %cst_10 = arith.constant dense<0.000000e+00> : vector<8x512xf32>
    %30 = tpu.matmul %28, %29, %cst_10 {dimension_numbers = #tpu.dot_dimension_numbers<[1], [0], [0], [1], [0, 0, 1, 1], [], []>} : vector<8x128xf32>, vector<128x512xf32>, vector<8x512xf32> -> vector<8x512xf32>
    %cst_11 = arith.constant 1.600000e+01 : f32
    %31 = vector.broadcast %cst_11 : f32 to vector<8x512xf32>
    %32 = arith.mulf %30, %31 : vector<8x512xf32>
    %33 = vector.extract_strided_slice %32 {offsets = [0, 0], sizes = [8, 64], strides = [1, 1]} : vector<8x512xf32> to vector<8x64xf32>
    %34 = vector.extract_strided_slice %32 {offsets = [0, 64], sizes = [8, 64], strides = [1, 1]} : vector<8x512xf32> to vector<8x64xf32>
    %35 = vector.extract_strided_slice %32 {offsets = [0, 128], sizes = [8, 64], strides = [1, 1]} : vector<8x512xf32> to vector<8x64xf32>
    %36 = vector.extract_strided_slice %32 {offsets = [0, 192], sizes = [8, 64], strides = [1, 1]} : vector<8x512xf32> to vector<8x64xf32>
    %37 = vector.extract_strided_slice %32 {offsets = [0, 256], sizes = [8, 64], strides = [1, 1]} : vector<8x512xf32> to vector<8x64xf32>
    %38 = vector.extract_strided_slice %32 {offsets = [0, 320], sizes = [8, 64], strides = [1, 1]} : vector<8x512xf32> to vector<8x64xf32>
    %39 = vector.extract_strided_slice %32 {offsets = [0, 384], sizes = [8, 64], strides = [1, 1]} : vector<8x512xf32> to vector<8x64xf32>
    %40 = vector.extract_strided_slice %32 {offsets = [0, 448], sizes = [8, 64], strides = [1, 1]} : vector<8x512xf32> to vector<8x64xf32>
    %41 = tpu.concatenate %33, %34, %35, %36, %37, %38, %39, %40 in 0 : vector<8x64xf32>, vector<8x64xf32>, vector<8x64xf32>, vector<8x64xf32>, vector<8x64xf32>, vector<8x64xf32>, vector<8x64xf32>, vector<8x64xf32> -> vector<64x64xf32>
    %42 = arith.mulf %41, %41 : vector<64x64xf32>
    %cst_12 = arith.constant dense<0.000000e+00> : vector<64xf32>
    %43 = vector.multi_reduction <add>, %42, %cst_12 [1] : vector<64x64xf32> to vector<64xf32>
    %44 = vector.shape_cast %43 : vector<64xf32> to vector<64x1xf32>
    %cst_13 = arith.constant 1.000000e-24 : f32
    %45 = vector.broadcast %cst_13 : f32 to vector<64x1xf32>
    %46 = arith.maximumf %44, %45 : vector<64x1xf32>
    %47 = math.rsqrt %46 : vector<64x1xf32>
    %cst_14 = arith.constant 4.000000e+00 : f32
    %48 = vector.broadcast %cst_14 : f32 to vector<64x1xf32>
    %49 = arith.mulf %47, %48 : vector<64x1xf32>
    %50 = vector.broadcast %49 : vector<64x1xf32> to vector<64x64xf32>
    %51 = arith.mulf %41, %50 : vector<64x64xf32>
    %c0_15 = arith.constant 0 : index
    %c0_16 = arith.constant 0 : index
    %52 = vector.load %arg9[%c0_15, %c0_16] : memref<16x64xf32, #tpu.memory_space<vmem>>, vector<16x64xf32>
    %c0_17 = arith.constant 0 : index
    %c0_18 = arith.constant 0 : index
    %53 = vector.load %arg10[%c0_17, %c0_18] : memref<16x64xf32, #tpu.memory_space<vmem>>, vector<16x64xf32>
    %cst_19 = arith.constant dense<0.000000e+00> : vector<64x16xf32>
    %54 = tpu.matmul %51, %52, %cst_19 {dimension_numbers = #tpu.dot_dimension_numbers<[1], [1], [0], [0], [0, 0, 1, 0], [], []>} : vector<64x64xf32>, vector<16x64xf32>, vector<64x16xf32> -> vector<64x16xf32>
    %cst_20 = arith.constant dense<0xFF800000> : vector<64xf32>
    %55 = vector.multi_reduction <maximumf>, %54, %cst_20 [1] : vector<64x16xf32> to vector<64xf32>
    %56 = vector.shape_cast %55 : vector<64xf32> to vector<64x1xf32>
    %57 = vector.broadcast %56 : vector<64x1xf32> to vector<64x16xf32>
    %58 = arith.subf %54, %57 : vector<64x16xf32>
    %59 = math.exp %58 : vector<64x16xf32>
    %cst_21 = arith.constant dense<0.000000e+00> : vector<64xf32>
    %60 = vector.multi_reduction <add>, %59, %cst_21 [1] : vector<64x16xf32> to vector<64xf32>
    %61 = vector.shape_cast %60 : vector<64xf32> to vector<64x1xf32>
    %cst_22 = arith.constant dense<0.000000e+00> : vector<64x64xf32>
    %62 = tpu.matmul %59, %53, %cst_22 {dimension_numbers = #tpu.dot_dimension_numbers<[1], [0], [0], [1], [0, 0, 1, 1], [], []>} : vector<64x16xf32>, vector<16x64xf32>, vector<64x64xf32> -> vector<64x64xf32>
    %63 = tpu.reciprocal %61 : vector<64x1xf32> -> vector<64x1xf32>
    %64 = vector.broadcast %63 : vector<64x1xf32> to vector<64x64xf32>
    %65 = arith.mulf %62, %64 : vector<64x64xf32>
    %66 = vector.extract_strided_slice %65 {offsets = [0, 0], sizes = [8, 64], strides = [1, 1]} : vector<64x64xf32> to vector<8x64xf32>
    %67 = vector.extract_strided_slice %65 {offsets = [8, 0], sizes = [8, 64], strides = [1, 1]} : vector<64x64xf32> to vector<8x64xf32>
    %68 = vector.extract_strided_slice %65 {offsets = [16, 0], sizes = [8, 64], strides = [1, 1]} : vector<64x64xf32> to vector<8x64xf32>
    %69 = vector.extract_strided_slice %65 {offsets = [24, 0], sizes = [8, 64], strides = [1, 1]} : vector<64x64xf32> to vector<8x64xf32>
    %70 = vector.extract_strided_slice %65 {offsets = [32, 0], sizes = [8, 64], strides = [1, 1]} : vector<64x64xf32> to vector<8x64xf32>
    %71 = vector.extract_strided_slice %65 {offsets = [40, 0], sizes = [8, 64], strides = [1, 1]} : vector<64x64xf32> to vector<8x64xf32>
    %72 = vector.extract_strided_slice %65 {offsets = [48, 0], sizes = [8, 64], strides = [1, 1]} : vector<64x64xf32> to vector<8x64xf32>
    %73 = vector.extract_strided_slice %65 {offsets = [56, 0], sizes = [8, 64], strides = [1, 1]} : vector<64x64xf32> to vector<8x64xf32>
    %74 = tpu.concatenate %66, %67, %68, %69, %70, %71, %72, %73 in 1 : vector<8x64xf32>, vector<8x64xf32>, vector<8x64xf32>, vector<8x64xf32>, vector<8x64xf32>, vector<8x64xf32>, vector<8x64xf32>, vector<8x64xf32> -> vector<8x512xf32>
    %c0_23 = arith.constant 0 : index
    %c0_24 = arith.constant 0 : index
    %75 = vector.load %arg5[%c0_23, %c0_24] : memref<512x128xf32, #tpu.memory_space<vmem>>, vector<512x128xf32>
    %cst_25 = arith.constant dense<0.000000e+00> : vector<8x128xf32>
    %76 = tpu.matmul %74, %75, %cst_25 {dimension_numbers = #tpu.dot_dimension_numbers<[1], [0], [0], [1], [0, 0, 1, 1], [], []>} : vector<8x512xf32>, vector<512x128xf32>, vector<8x128xf32> -> vector<8x128xf32>
    %c0_26 = arith.constant 0 : index
    %c0_27 = arith.constant 0 : index
    %77 = vector.load %arg7[%c0_26, %c0_27] : memref<1x128xf32, #tpu.memory_space<vmem>>, vector<1x128xf32>
    %cst_28 = arith.constant dense<0.000000e+00> : vector<8xf32>
    %78 = vector.multi_reduction <add>, %76, %cst_28 [1] : vector<8x128xf32> to vector<8xf32>
    %79 = vector.shape_cast %78 : vector<8xf32> to vector<8x1xf32>
    %cst_29 = arith.constant 1.280000e+02 : f32
    %80 = vector.broadcast %cst_29 : f32 to vector<8x1xf32>
    %81 = arith.divf %79, %80 : vector<8x1xf32>
    %82 = vector.broadcast %81 : vector<8x1xf32> to vector<8x128xf32>
    %83 = arith.subf %76, %82 : vector<8x128xf32>
    %84 = arith.mulf %83, %83 : vector<8x128xf32>
    %cst_30 = arith.constant dense<0.000000e+00> : vector<8xf32>
    %85 = vector.multi_reduction <add>, %84, %cst_30 [1] : vector<8x128xf32> to vector<8xf32>
    %86 = vector.shape_cast %85 : vector<8xf32> to vector<8x1xf32>
    %cst_31 = arith.constant 1.280000e+02 : f32
    %87 = vector.broadcast %cst_31 : f32 to vector<8x1xf32>
    %88 = arith.divf %86, %87 : vector<8x1xf32>
    %89 = vector.broadcast %81 : vector<8x1xf32> to vector<8x128xf32>
    %90 = arith.subf %76, %89 : vector<8x128xf32>
    %cst_32 = arith.constant 9.99999974E-6 : f32
    %91 = vector.broadcast %cst_32 : f32 to vector<8x1xf32>
    %92 = arith.addf %88, %91 : vector<8x1xf32>
    %93 = math.rsqrt %92 : vector<8x1xf32>
    %94 = vector.broadcast %93 : vector<8x1xf32> to vector<8x128xf32>
    %95 = arith.mulf %90, %94 : vector<8x128xf32>
    %96 = vector.broadcast %77 : vector<1x128xf32> to vector<8x128xf32>
    %97 = arith.mulf %95, %96 : vector<8x128xf32>
    %c0_33 = arith.constant 0 : index
    %c0_34 = arith.constant 0 : index
    %c0_35 = arith.constant 0 : index
    %98 = vector.load %arg8[%c0_33, %c0_34, %c0_35] : memref<1x8x128xf32, #tpu.memory_space<vmem>>, vector<1x8x128xf32>
    %99 = vector.shape_cast %98 : vector<1x8x128xf32> to vector<8x128xf32>
    %100 = vector.shape_cast %97 : vector<8x128xf32> to vector<1x8x128xf32>
    tpu.vector_store %arg8[%c0_33, %c0_34, %c0_35], %100 {strides = array<i32>} : memref<1x8x128xf32, #tpu.memory_space<vmem>>, vector<1x8x128xf32>,
    return
  }
  func.func @transform_0(%arg0: i32, %arg1: i32) -> (i32, i32, i32) {
    %c0_i32 = arith.constant 0 : i32
    %c0_i32_0 = arith.constant 0 : i32
    %c0_i32_1 = arith.constant 0 : i32
    return %arg0, %c0_i32, %c0_i32_0 : i32, i32, i32
  }
  func.func @transform_1(%arg0: i32, %arg1: i32) -> (i32, i32) {
    %c0_i32 = arith.constant 0 : i32
    %c0_i32_0 = arith.constant 0 : i32
    %c0_i32_1 = arith.constant 0 : i32
    return %c0_i32, %c0_i32_0 : i32, i32
  }
  func.func @transform_2(%arg0: i32, %arg1: i32) -> (i32, i32) {
    %c0_i32 = arith.constant 0 : i32
    %c0_i32_0 = arith.constant 0 : i32
    %c0_i32_1 = arith.constant 0 : i32
    return %c0_i32, %c0_i32_0 : i32, i32
  }
  func.func @transform_3(%arg0: i32, %arg1: i32) -> (i32, i32) {
    %c0_i32 = arith.constant 0 : i32
    %c0_i32_0 = arith.constant 0 : i32
    %c0_i32_1 = arith.constant 0 : i32
    return %c0_i32, %c0_i32_0 : i32, i32
  }
  func.func @transform_4(%arg0: i32, %arg1: i32) -> (i32, i32) {
    %c0_i32 = arith.constant 0 : i32
    %c0_i32_0 = arith.constant 0 : i32
    %c0_i32_1 = arith.constant 0 : i32
    return %c0_i32, %c0_i32_0 : i32, i32
  }
  func.func @transform_5(%arg0: i32, %arg1: i32) -> (i32, i32) {
    %c0_i32 = arith.constant 0 : i32
    %c0_i32_0 = arith.constant 0 : i32
    %c0_i32_1 = arith.constant 0 : i32
    return %c0_i32, %c0_i32_0 : i32, i32
  }
  func.func @transform_6(%arg0: i32, %arg1: i32) -> (i32, i32, i32) {
    %c0_i32 = arith.constant 0 : i32
    %c0_i32_0 = arith.constant 0 : i32
    return %arg0, %arg1, %c0_i32 : i32, i32, i32
  }
}

</mosaic_0001>

<bundles_post_ra>
// kernel: tpu_custom_call.1
= control target key start
LH: loop header
LB: loop body
LE: loop exit
PB: predicated region body
PF: predicated region fallthrough
CT: control target
= control target key end

     0   :  { %s2868_s0 = inlined_call_operand.hbm [shape: f32[2,16,128], index: 0, kind: input, shape index: {}]   ;;  %s2869_s1 = inlined_call_operand.hbm [shape: f32[128,512], index: 1, kind: input, shape index: {}]   ;;  %s2870_s2 = inlined_call_operand.hbm [shape: f32[128,128], index: 2, kind: input, shape index: {}]   ;;  %s2871_s3 = inlined_call_operand.hbm [shape: f32[512,128], index: 3, kind: input, shape index: {}]   ;;  %s2872_s4 = inlined_call_operand.vmem [shape: f32[1,128], index: 4, kind: input, shape index: {}]   ;;  %s2873_s5 = inlined_call_operand.vmem [shape: f32[1,128], index: 5, kind: input, shape index: {}]   ;;  %s2874_s6 = inlined_call_operand.hbm [shape: f32[2,16,128], index: 6, kind: output, shape index: {}]  }
   0x1   :  { %2887 = sst [smem:[#allocation21_spill]] %s2869_s1 }
   0x2   :  { %2888 = sst [smem:[#allocation22_spill]] %s2870_s2 }
   0x3   :  { %2889 = sst [smem:[#allocation23_spill]] %s2871_s3 }
   0x4   :  { %2890 = sst [smem:[#allocation24_spill]] %s2873_s5 }
   0x5   :  { %2891 = sst [smem:[#allocation25_spill]] %s2874_s6 }
   0x6   :  { %11 = vsyncpa [#allocation5], 0 }
   0x7   :  { %13 = vsyncpa [#allocation5 + $0x1], 0 }
   0x8   :  { %14 = vsyncpa [#allocation8], 0 }
   0x9   :  { %15 = vsyncpa [#allocation11], 0 }
   0xa   :  { %16 = vsyncpa [#allocation6], 0 }
   0xb   :  { %18 = vsyncpa [#allocation6 + $0x1], 0  ;;  %s2421_s21 = smov 0   ;;  %s2423_s22 = smov 0  }
   0xc   :  { %s2425_s23 = smov 0   ;;  %s2427_s24 = smov 0  }
   0xd   :  { %s2429_s25 = smov 0   ;;  %s2431_s26 = smov 0  }
   0xe   :  { %s2433_s27 = smov 0   ;;  %s2435_s28 = smov 0  }
   0xf   :  { %s2437_s29 = smov 0   ;;  %s2439_s30 = smov 0  }
  0x10   :  { %s2441_s7 = smov 0  }
  0x11 LB: > { %2892 = sst [smem:[#allocation17_spill]] %s2332_s21  ;;  %s1530_s8 = sadd.s32 4294967295, %s2372_s7   ;;  %s2372_s7 = sphi %s2441_s7, %s24_s7   ;;  %s2368_s30 = sphi %s2439_s30, %s2931_s30   ;;  %s2364_s29 = sphi %s2437_s29, %s2930_s29   ;;  %s2360_s28 = sphi %s2435_s28, %s2929_s28   ;;  %s2356_s27 = sphi %s2433_s27, %s2928_s27   ;;  %s2352_s26 = sphi %s2431_s26, %s2927_s26   ;;  %s2348_s25 = sphi %s2429_s25, %s2926_s25   ;;  %s2344_s24 = sphi %s2427_s24, %s2925_s24   ;;  %s2340_s23 = sphi %s2425_s23, %s2924_s23   ;;  %s2336_s22 = sphi %s2423_s22, %s2923_s22   ;;  %s2332_s21 = sphi %s2421_s21, %s2922_s21  }
  0x12   : > { %2893 = sst [smem:[#allocation18_spill]] %s2360_s28  ;;  %s1531_s9 = sadd.s32 4294967294, %s2372_s7  }
  0x13   : > { %p56_p0 = scmp.ne.s32.totalorder %s2348_s25, %s2344_s24  ;;  %p2477_p1 = scmp.eq.s32.totalorder %s1530_s8, 0 }
  0x14   : > { %p186_p2 = scmp.ne.s32.totalorder %s2340_s23, %s2336_s22  ;;  %p187_p4 = scmp.eq.s32.totalorder %s1530_s8, 3 }
  0x15   : > { %s2894_s10 = scalar_select %p2477_p1, 1, 0 }
  0x16   : > { %p2486_p3 = por %p2477_p1, %p56_p0  ;;  %p192_p5 = scmp.ne.s32.totalorder %s2336_s22, %s2332_s21 }
  0x17   : > { %p193_p6 = scmp.eq.s32.totalorder %s1531_s9, 3  ;;  %p2492_p7 = por %p187_p4, %p186_p2 }
  0x18   : > { %s2895_s12 = scalar_select %p2486_p3, 1, 0 }
  0x19   : > { %s2896_s13 = scalar_select %p2492_p7, 1, 0 }
  0x1a   : > { %p1532_p8 = scmp.ge.s32.totalorder %s2372_s7, 1  ;;  %p2497_p9 = por %p193_p6, %p192_p5 }
  0x1b   : > { %2897 = sst [smem:[#allocation19_spill]] %s2896_s13  ;;  %p200_p10 = scmp.lt.s32.totalorder %s2372_s7, 5 }
  0x1c   : > { %s2898_s14 = scalar_select %p2497_p9, 1, 0 }
  0x1d   : > { %p2502_p11 = pnand %p1532_p8, %p200_p10  ;;  %s2374_s16 = smov [#allocation7]  }
  0x1e   : > { %2899 = sst [smem:[#allocation20_spill]] %s2898_s14  ;;  %s212_s17 = sshll.u32 %s2374_s16, 4  ;;  %s213_s17 = int_to_ptr.vmem [resolvable:$true] %s212_s17 }
  0x1f   : > { %s2900_s15 = scalar_select %p2502_p11, 1, 0 }
  0x20   : > { %p1934_p12 = pneg %p2502_p11  ;;  %s2375_s19 = smov [#allocation9]  }
  0x21   : > { %s225_s20 = sshll.u32 %s2375_s19, 4  ;;  %s2902_s1 = sld [smem:[#allocation21_spill]]  ;;  %s2514_s20 = int_to_ptr.vmem [resolvable:$true] %s225_s20 }
  0x22   : > { %p2510_p13 = pnand %p1934_p12, %p2477_p1 }
  0x24   : > { %p2524_p2 = pneg %p2510_p13 }
  0x27   : > { %s2128_s9 = scalar_lea.hbm %s2902_s1, 8192 }
  0x28   : > { %p2129_p0 = scmp.ne.s32.totalorder %s2902_s1, %s2128_s9  ;;  %p2135_p6 = scmp.lt.u32.totalorder %s2128_s9, %s2902_s1 }
  0x2a   : > { %p2131_p4 = pnand %p2524_p2, %p2129_p0 }
  0x2c   : > { %p2132_p5 = pneg %p2131_p4 }
  0x2e   : > { %p2137_p8 = pnand %p2135_p6, %p2132_p5 }
  0x30   : > { %2140 = shalt.err (!%p2137_p8)
}
  0x31   : > { %s2141_s24 = scalar_lea.vmem %s213_s17, 8192  ;;  %p2149_p7 = scmp.lt.s32.totalorder %s213_s17, %s213_s17 }
  0x32   : > { %p2142_p10 = scmp.ne.s32.totalorder %s213_s17, %s2141_s24  ;;  %p2150_p1 = scmp.lt.s32.totalorder %s2141_s24, %s2141_s24 }
  0x34   : > { %p2144_p12 = pnand %p2142_p10, %p2524_p2  ;;  %p2151_p3 = por %p2150_p1, %p2149_p7 }
  0x36   : > { %p2145_p9 = pneg %p2144_p12 }
  0x38   : > { %p2152_p11 = pnand %p2151_p3, %p2145_p9 }
  0x3a   : > { %2155 = shalt.err (!%p2152_p11)
}
  0x3b   : > { %s2376_s11 = smov 512   ;;  %s2377_s14 = smov 32  }
  0x3c   : > { %1937 = dma.hbm_to_vmem [thread:$0]  (!%p2510_p13), %s2902_s1, 8192, %s213_s17, [#allocation8], %s2376_s11, %s2376_s11, %s2377_s14  }
  0x3d   : > { %s2904_s2 = sld [smem:[#allocation22_spill]] }
  0x43   : > { %s2156_s6 = scalar_lea.hbm %s2904_s2, 2048 }
  0x44   : > { %p2157_p0 = scmp.ne.s32.totalorder %s2904_s2, %s2156_s6  ;;  %p2163_p7 = scmp.lt.u32.totalorder %s2156_s6, %s2904_s2 }
  0x46   : > { %p2159_p1 = pnand %p2157_p0, %p2524_p2 }
  0x48   : > { %p2160_p3 = pneg %p2159_p1 }
  0x4a   : > { %p2165_p9 = pnand %p2163_p7, %p2160_p3 }
  0x4c   : > { %2168 = shalt.err (!%p2165_p9)
}
  0x4d   : > { %s2169_s17 = scalar_lea.vmem %s2514_s20, 2048  ;;  %p2177_p6 = scmp.lt.s32.totalorder %s2514_s20, %s2514_s20 }
  0x4e   : > { %p2170_p11 = scmp.ne.s32.totalorder %s2514_s20, %s2169_s17  ;;  %p2178_p8 = scmp.lt.s32.totalorder %s2169_s17, %s2169_s17 }
  0x50   : > { %p2172_p4 = pnand %p2170_p11, %p2524_p2  ;;  %p2179_p10 = por %p2178_p8, %p2177_p6 }
  0x52   : > { %p2173_p5 = pneg %p2172_p4 }
  0x54   : > { %p2180_p12 = pnand %p2179_p10, %p2173_p5 }
  0x56   : > { %2183 = shalt.err (!%p2180_p12)
}
  0x57   : > { %s2885_s5 = smov 128   ;;  %s2886_s6 = smov 8  }
  0x58   : > { %1940 = dma.hbm_to_vmem [thread:$0]  (!%p2510_p13), %s2904_s2, 2048, %s2514_s20, [#allocation8], %s2885_s5, %s2885_s5, %s2886_s6  }
  0x59   : > { %s2380_s11 = smov [#allocation10]   ;;  %s2905_s3 = sld [smem:[#allocation23_spill]] }
  0x5a   : > { %s238_s14 = sshll.u32 %s2380_s11, 4  ;;  %s239_s14 = int_to_ptr.vmem [resolvable:$true] %s238_s14 }
  0x5f   : > { %s2184_s9 = scalar_lea.hbm %s2905_s3, 8192 }
  0x60   : > { %p2185_p0 = scmp.ne.s32.totalorder %s2905_s3, %s2184_s9  ;;  %p2191_p7 = scmp.lt.u32.totalorder %s2184_s9, %s2905_s3 }
  0x62   : > { %p2187_p1 = pnand %p2185_p0, %p2524_p2 }
  0x64   : > { %p2188_p3 = pneg %p2187_p1 }
  0x66   : > { %p2193_p9 = pnand %p2191_p7, %p2188_p3 }
  0x68   : > { %2196 = shalt.err (!%p2193_p9)
}
  0x69   : > { %s2197_s20 = scalar_lea.vmem %s239_s14, 8192  ;;  %p2205_p6 = scmp.lt.s32.totalorder %s239_s14, %s239_s14 }
  0x6a   : > { %p2198_p11 = scmp.ne.s32.totalorder %s239_s14, %s2197_s20  ;;  %p2206_p8 = scmp.lt.s32.totalorder %s2197_s20, %s2197_s20 }
  0x6c   : > { %p2200_p4 = pnand %p2198_p11, %p2524_p2  ;;  %p2207_p10 = por %p2206_p8, %p2205_p6 }
  0x6e   : > { %p2201_p5 = pneg %p2200_p4 }
  0x70   : > { %p2208_p12 = pnand %p2207_p10, %p2201_p5 }
  0x72   : > { %2211 = shalt.err (!%p2208_p12)
}
  0x73   : > { %1943 = dma.hbm_to_vmem [thread:$0]  (!%p2510_p13), %s2905_s3, 8192, %s239_s14, [#allocation11], %s2885_s5, %s2885_s5, %s2886_s6  }
  0x74   : > { %s33_s16 = sadd.s32 1, %s2364_s29  ;;  %s36_s18 = sadd.s32 1, %s2368_s30 }
  0x75   : > { %p34_p2 = scmp.ge.s32.totalorder %s33_s16, 2  ;;  %s43_s13 = sadd.s32 1, %s2352_s26 }
  0x76   : > { %p50_p0 = scmp.ne.s32.totalorder %s2352_s26, %s2348_s25  ;;  %p51_p1 = scmp.eq.s32.totalorder %s2372_s7, 0 }
  0x77   : > { %s2933_s16 = smov (%p34_p2, %s33_s16), 0  ;;  %s2935_s18 = smov (!%p34_p2, %s36_s18), %s2368_s30 }
  0x78   : > { %s172_s11 = ssub.s32 %s2364_s29, %s2933_s16  ;;  %p38_p3 = scmp.ge.s32.totalorder %s2935_s18, 2 }
  0x79   : > { %p1955_p7 = scmp.lt.s32.totalorder %s2372_s7, 4  ;;  %p2599_p13 = por %p51_p1, %p50_p0 }
  0x7a   : > { %s258_s21 = sand.u32 1, %s2352_s26   ;;  %s2937_s18 = smov (%p38_p3, %s2935_s18), 0 }
  0x7b   : > { %s1537_s8 = sshll.u32 %s258_s21, 4  ;;  %s40_s9 = ssub.s32 %s2368_s30, %s2937_s18 }
  0x7c   : > { %p41_p9 = scmp.eq.s32.totalorder %s40_s9, 0  ;;  %s173_s19 = sor.u32 %s172_s11, %s40_s9 }
  0x7d   : > { %p174_p11 = scmp.eq.s32.totalorder %s173_s19, 0  ;;  %s1572_s24 = sshll.u32 %s2368_s30, 8 }
  0x7e   : > { %s2610_s17 = scalar_select %p41_p9, %s2352_s26, %s43_s13  }
  0x7f   : > { %s2907_s20 = sadd.s32 1, %s2340_s23  ;;  %s2620_s6 = scalar_lea.hbm %s2868_s0, %s1572_s24 }
  0x80   : > { %s2615_s1 = scalar_select %p174_p11, %s2340_s23, %s2907_s20  }
  0x81   : > { %s262_s2 = scalar_lea.vmem [#allocation4], %s1537_s8  ;;  %p2628_p4 = pnand %p1955_p7, %p2599_p13 }
  0x82   : > { %s269_s3 = sshll.u32 %s262_s2, 4  ;;  %s2632_s11 = scalar_lea.sflag [#allocation5], %s258_s21  ;;  %s2622_s3 = int_to_ptr.vmem [resolvable:$true] %s269_s3 }
  0x83   : > { %s2212_s5 = scalar_lea.hbm %s2620_s6, 256  ;;  %p2214_p6 = pneg %p2628_p4 }
  0x84   : > { %p2213_p5 = scmp.ne.s32.totalorder %s2620_s6, %s2212_s5  ;;  %s2217_s14 = scalar_lea.hbm %s2868_s0, 512 }
  0x85   : > { %p2218_p12 = scmp.lt.u32.totalorder %s2620_s6, %s2868_s0  ;;  %p2219_p2 = scmp.lt.u32.totalorder %s2217_s14, %s2212_s5 }
  0x86   : > { %p2215_p8 = pnand %p2214_p6, %p2213_p5  ;;  %p2221_p1 = scmp.lt.u32.totalorder %s2212_s5, %s2620_s6 }
  0x87   : > { %p2220_p0 = por %p2219_p2, %p2218_p12 }
  0x88   : > { %p2216_p10 = pneg %p2215_p8 }
  0x89   : > { %p2222_p3 = por %p2221_p1, %p2220_p0 }
  0x8b   : > { %p2223_p7 = pnand %p2222_p3, %p2216_p10 }
  0x8d   : > { %2226 = shalt.err (!%p2223_p7)
}
  0x8e   : > { %s2227_s21 = scalar_lea.vmem %s2622_s3, 256  ;;  %s2381_s24 = smov [#allocation4]  }
  0x8f   : > { %p2228_p13 = scmp.ne.s32.totalorder %s2622_s3, %s2227_s21  ;;  %s2232_s20 = sshll.u32 %s2381_s24, 4  ;;  %s2233_s20 = int_to_ptr.vmem [resolvable:$false] %s2232_s20 }
  0x90   : > { %s2234_s28 = scalar_lea.vmem %s2233_s20, 512  ;;  %p2235_p5 = scmp.lt.s32.totalorder %s2622_s3, %s2233_s20 }
  0x91   : > { %p2230_p9 = pnand %p2228_p13, %p2214_p6  ;;  %p2236_p8 = scmp.lt.s32.totalorder %s2234_s28, %s2227_s21 }
  0x93   : > { %p2231_p11 = pneg %p2230_p9  ;;  %p2237_p12 = por %p2236_p8, %p2235_p5 }
  0x95   : > { %p2238_p2 = pnand %p2237_p12, %p2231_p11 }
  0x97   : > { %2241 = shalt.err (!%p2238_p2)
}
  0x98   : > { %s2909_s5 = smov 8   ;;  %s2910_s2 = smov 128  }
  0x99   : > { %1947 = dma.hbm_to_vmem [thread:$0]  (!%p2628_p4), %s2620_s6, 256, %s2622_s3, %s2632_s11, %s2910_s2, %s2910_s2, %s2909_s5  }
  0x9a   : > { %p2911_p6 = scmp.ne.s32.totalorder %s2900_s15, 0 }
  0x9b   : > { %s283_s8 = sand.u32 (!%p2911_p6), 1, %s2348_s25   ;;  %p2912_p10 = scmp.ne.s32.totalorder (!%p2911_p6), %s2895_s12, 0 }
  0x9c   : > { %281 = sbr.rel (%p2911_p6) target bundleno = 2922 (0xb6a), region = 44  ;;  %s1541_s14 = sshll.u32 (!%p2911_p6), %s283_s8, 4 }
  0x9d   : > { %s284_s9 = scalar_lea.sflag (!%p2911_p6), [#allocation5], %s283_s8  ;;  %s2666_s19 = scalar_lea.vmem (!%p2911_p6), [#allocation4], %s1541_s14 }
  0xa3   : > { %2315 = dma.done.wait (%p2912_p10), %s284_s9, 256  }
  0xa4   : > { %2317 = vsyncadd (%p2912_p10), %s284_s9, 4294967040  ;;  %p2913_p0 = scmp.ne.s32.totalorder %s2894_s10, 0 }
  0xa6   : > { %2319 = dma.done.wait (%p2913_p0), [#allocation8], 10240  }
  0xa7   : > { %2321 = vsyncadd (%p2913_p0), [#allocation8], 4294957056 }
  0xa8   : > { %2323 = dma.done.wait (%p2913_p0), [#allocation11], 8192  }
  0xa9   : > { %2325 = vsyncadd (%p2913_p0), [#allocation11], 4294959104  ;;  %s325_s3 = sand.u32 1, %s2336_s22   ;;  %v2688_v0 = vld [vmem:[%s2872_s4] sm:$0x1]  ;;  %p1546_p4 = scmp.ne.s32.totalorder %s2356_s27, 0 }
  0xaa   : > { %s2683_s15 = sshll.u32 %s325_s3, 3  ;;  %v333_v1 = vld [vmem:[%s2666_s19] sm:$0xff] (!%p1546_p4)  ;;  %v334_v2 = vld [vmem:[%s2666_s19 + $0x8] sm:$0xff] (!%p1546_p4)  ;;  %v359_v37 = vlaneseq (!%p1546_p4)  ;;  %vm459_vm0 = vcmask (!%p1546_p4), 523264   ;;  %s2382_s10 = smov (!%p1546_p4), 64  }
  0xab   : > { %s327_s13 = scalar_lea.vmem [#allocation12], %s2683_s15  ;;  %332 = sbr.rel (%p1546_p4) target bundleno = 860 (0x35c), region = 64  ;;  %335 = vadd.xlane.f32.xlu0 (!%p1546_p4), %v333_v1  ;;  %v366_v3 = vld [vmem:[#allocation9] sm:$0xff] (!%p1546_p4)  ;;  %v367_v4 = vld [vmem:[#allocation9 + $0x8] sm:$0xff] (!%p1546_p4)  ;;  %v368_v5 = vld [vmem:[#allocation9 + $0x10] sm:$0xff] (!%p1546_p4) }
  0xac   : > { %v1748_v6 = vpack.c.bf16 (!%p1546_p4), %v367_v4, %v366_v3  ;;  %v369_v7 = vld [vmem:[#allocation9 + $0x18] sm:$0xff] (!%p1546_p4)  ;;  %v370_v9 = vld [vmem:[#allocation9 + $0x20] sm:$0xff] (!%p1546_p4)  ;;  %v371_v10 = vld [vmem:[#allocation9 + $0x28] sm:$0xff] (!%p1546_p4)  ;;  %v360_v41 = vshrl.u32 (!%p1546_p4), %v359_v37, 7 }
  0xad   : > { %v1752_v8 = vpack.c.bf16 (!%p1546_p4), %v369_v7, %v368_v5  ;;  %v1756_v11 = vpack.c.bf16 (!%p1546_p4), %v371_v10, %v370_v9  ;;  %v372_v20 = vld [vmem:[#allocation9 + $0x30] sm:$0xff] (!%p1546_p4)  ;;  %v373_v21 = vld [vmem:[#allocation9 + $0x38] sm:$0xff] (!%p1546_p4)  ;;  %v374_v23 = vld [vmem:[#allocation9 + $0x40] sm:$0xff] (!%p1546_p4) }
  0xae   : > { %1749 = vmatprep.subr.bf16.mxu0 (!%p1546_p4), %v1748_v6  ;;  %v1760_v22 = vpack.c.bf16 (!%p1546_p4), %v373_v21, %v372_v20  ;;  %v375_v24 = vld [vmem:[#allocation9 + $0x48] sm:$0xff] (!%p1546_p4)  ;;  %v376_v26 = vld [vmem:[#allocation9 + $0x50] sm:$0xff] (!%p1546_p4)  ;;  %v377_v27 = vld [vmem:[#allocation9 + $0x58] sm:$0xff] (!%p1546_p4)  ;;  %v361_v43 = vsub.s32 (!%p1546_p4), 0, %v360_v41 }
  0xaf   : > { %337 = vadd.xlane.f32.xlu0 (!%p1546_p4), %v334_v2  ;;  %1751 = vmatpush3.bf16.msra.mxu0 (!%p1546_p4), %v1748_v6  ;;  %v1764_v25 = vpack.c.bf16 (!%p1546_p4), %v375_v24, %v374_v23  ;;  %v378_v28 = vld [vmem:[#allocation9 + $0x60] sm:$0xff] (!%p1546_p4)  ;;  %v1768_v29 = vpack.c.bf16 (!%p1546_p4), %v377_v27, %v376_v26  ;;  %v379_v30 = vld [vmem:[#allocation9 + $0x68] sm:$0xff] (!%p1546_p4)  ;;  %v380_v32 = vld [vmem:[#allocation9 + $0x70] sm:$0xff] (!%p1546_p4) }
  0xb0   : > { %1753 = vmatprep.subr.bf16.mxu0 (!%p1546_p4), %v1752_v8  ;;  %v1772_v31 = vpack.c.bf16 (!%p1546_p4), %v379_v30, %v378_v28  ;;  %v381_v33 = vld [vmem:[#allocation9 + $0x78] sm:$0xff] (!%p1546_p4)  ;;  %v362_v44 = vrot.slane (!%p1546_p4), %v2688_v0, %v361_v43 }
  0xb1   : > { %v1776_v34 = vpack.c.bf16 (!%p1546_p4), %v381_v33, %v380_v32 }
  0xb3   : > { %1755 = vmatpush3.bf16.msra.mxu0 %v1752_v8 }
  0xb4   : > { %1757 = vmatprep.subr.bf16.mxu0 %v1756_v11 }
  0xb7   : > { %1759 = vmatpush3.bf16.msra.mxu0 %v1756_v11 }
  0xb8   : > { %1761 = vmatprep.subr.bf16.mxu0 %v1760_v22 }
  0xbb   : > { %1763 = vmatpush3.bf16.msra.mxu0 %v1760_v22 }
  0xbc   : > { %1765 = vmatprep.subr.bf16.mxu0 %v1764_v25 }
  0xbf   : > { %1767 = vmatpush3.bf16.msra.mxu0 %v1764_v25 }
  0xc0   : > { %1769 = vmatprep.subr.bf16.mxu0 %v1768_v29 }
  0xc3   : > { %1771 = vmatpush3.bf16.msra.mxu0 %v1768_v29 }
  0xc4   : > { %1773 = vmatprep.subr.bf16.mxu0 %v1772_v31 }
  0xc7   : > { %1775 = vmatpush3.bf16.msra.mxu0 %v1772_v31 }
  0xc8   : > { %1777 = vmatprep.subr.bf16.mxu0 %v1776_v34 }
  0xcb   : > { %1779 = vmatpush3.bf16.msra.mxu0 %v1776_v34 }
 0x138   : > { %v336_v12 = vpop.xlane.xlu0 %335 }
 0x139   : > { %v340_v13 = vmul.f32 0.0078125, %v336_v12 }
 0x13b   : > { %v342_v14 = vsub.f32 %v333_v1, %v340_v13 }
 0x13c   : > { %v338_v15 = vpop.xlane.xlu0 %337 }
 0x13d   : > { %v341_v16 = vmul.f32 0.0078125, %v338_v15  ;;  %v344_v17 = vmul.f32 %v342_v14, %v342_v14 }
 0x13f   : > { %v343_v18 = vsub.f32 %v334_v2, %v341_v16  ;;  %346 = vadd.xlane.f32.xlu1 %v344_v17 }
 0x141   : > { %v345_v19 = vmul.f32 %v343_v18, %v343_v18 }
 0x143   : > { %348 = vadd.xlane.f32.xlu1 %v345_v19 }
 0x1cc   : > { %v347_v35 = vpop.xlane.xlu1 %346 }
 0x1cd   : > { %v350_v36 = vmul.f32 0.0078125, %v347_v35 }
 0x1cf   : > { %v352_v38 = vadd.f32 1e-05, %v350_v36 }
 0x1d0   : > { %v349_v39 = vpop.xlane.xlu1 %348 }
 0x1d1   : > { %2058 = vrsqrt.f32 %v352_v38  ;;  %v351_v40 = vmul.f32 0.0078125, %v349_v39 }
 0x1d3   : > { %v353_v42 = vadd.f32 1e-05, %v351_v40 }
 0x1d5   : > { %2060 = vrsqrt.f32 %v353_v42 }
 0x1db   : > { %v2059_v45 = vpop.eup %2058 }
 0x1dc   : > { %v356_v46 = vmul.f32 %v2059_v45, %v342_v14 }
 0x1de   : > { %v364_v47 = vmul.f32 %v362_v44, %v356_v46 }
 0x1df   : > { %v2061_v48 = vpop.eup %2060 }
 0x1e0   : > { %1713 = vmatprep.mubr.f32.mxu0 %v364_v47  ;;  %v357_v49 = vmul.f32 %v2061_v48, %v343_v18 }
 0x1e2   : > { %v365_v50 = vmul.f32 %v362_v44, %v357_v49 }
 0x1e4   : > { %1714 = vmatmul.mubr.f32.vlgmr.msra.gmra.mrb[0].mxu0 %v365_v50 }
 0x2b7   : > { %v1715_v51 = vpop.f32.mrb[0].mxu0 }
 0x2b8   : > { %v448_v52 = vpop.f32.mrb[1].mxu0  ;;  %v458_v53 = vmul.f32 %v1715_v51, %v1715_v51 }
 0x2b9   : > { %v457_v54 = vmul.f32 %v448_v52, %v448_v52 }
 0x2ba   : > { %v463_v55 = vsel %vm459_vm0, %v458_v53, 0.0 }
 0x2bb   : > { %464 = vadd.xlane.f32.xlu1 %v463_v55  ;;  %v460_v56 = vsel %vm459_vm0, %v457_v54, 0.0 }
 0x2bc   : > { %461 = vadd.xlane.f32.xlu0 %v460_v56 }
 0x2cc   : > { %480 = vrot.lane.b32.xlu1 %v1715_v51, %s2382_s10 }
 0x2d2   : > { %478 = vrot.lane.b32.xlu0 %v448_v52, %s2382_s10 }
 0x348   : > { %v465_v57 = vpop.xlane.xlu1 %464 }
 0x349   : > { %v467_v58 = vmax.f32 %v465_v57, 1e-24  ;;  %v462_v59 = vpop.xlane.xlu0 %461 }
 0x34a   : > { %v466_v60 = vmax.f32 %v462_v59, 1e-24 }
 0x34b   : > { %2062 = vrsqrt.f32 %v467_v58 }
 0x34c   : > { %2064 = vrsqrt.f32 %v466_v60  ;;  %v481_v61 = vpop.permute.xlu1 %480 }
 0x34d   : > { %485 = vst.msk [vmem:[#allocation3 + $0x8] sm:$0xff] %vm459_vm0, %v481_v61  ;;  %v479_v62 = vpop.permute.xlu0 %478 }
 0x34e   : > { %484 = vst.msk [vmem:[#allocation3] sm:$0xff] %vm459_vm0, %v479_v62 }
 0x355   : > { %v2063_v63 = vpop.eup %2062 }
 0x356   : > { %v2065_v1 = vpop.eup %2064  ;;  %v471_v2 = vmul.f32 4.0, %v2063_v63 }
 0x357   : > { %v470_v3 = vmul.f32 4.0, %v2065_v1 }
 0x358   : > { %v473_v4 = vmul.f32 %v1715_v51, %v471_v2 }
 0x359   : > { %v472_v5 = vmul.f32 %v470_v3, %v448_v52 }
 0x35a   : > { %475 = vst.msk [vmem:[#allocation2 + $0x8] sm:$0xff] %vm459_vm0, %v473_v4 }
 0x35b   : > { %474 = vst.msk [vmem:[#allocation2] sm:$0xff] %vm459_vm0, %v472_v5 }
 0x35c PF: > { %s1547_s11 = sshll.u32 %s2356_s27, 3  ;;  %v509_v7 = vld [vmem:[#allocation7 + $0x8] sm:$0xff]  ;;  %v511_v9 = vld [vmem:[#allocation7 + $0x18] sm:$0xff]  ;;  %v508_v12 = vld [vmem:[#allocation7] sm:$0xff]  ;;  %s2384_s24 = smov 64   ;;  %vm742_vm1 = vcmask 523264  }
 0x35d   : > { %s487_s21 = scalar_lea.vmem %s2666_s19, %s1547_s11 [#allocation4]  ;;  %v513_v8 = vld [vmem:[#allocation7 + $0x28] sm:$0xff]  ;;  %v515_v11 = vld [vmem:[#allocation7 + $0x38] sm:$0xff]  ;;  %v512_v13 = vld [vmem:[#allocation7 + $0x20] sm:$0xff]  ;;  %vm938_vm3 = vcmask 130048   ;;  %s2914_s20 = sld [smem:[#allocation18_spill]] }
 0x35e   : > { %v488_v6 = vld [vmem:[%s487_s21] sm:$0xff]  ;;  %v1780_v10 = vpack.c.bf16 %v513_v8, %v509_v7  ;;  %v1812_v14 = vpack.c.bf16 %v515_v11, %v511_v9  ;;  %v1782_v15 = vpack.c.bf16 %v512_v13, %v508_v12  ;;  %v510_v16 = vld [vmem:[#allocation7 + $0x10] sm:$0xff]  ;;  %v517_v18 = vld [vmem:[#allocation7 + $0x48] sm:$0xff]  ;;  %s2915_s28 = sld [smem:[#allocation19_spill]]  ;;  %s2916_s9 = sld [smem:[#allocation24_spill]] }
 0x35f   : > { %489 = vadd.xlane.f32.xlu0 %v488_v6  ;;  %v514_v17 = vld [vmem:[#allocation7 + $0x30] sm:$0xff]  ;;  %v521_v20 = vld [vmem:[#allocation7 + $0x68] sm:$0xff]  ;;  %v519_v21 = vld [vmem:[#allocation7 + $0x58] sm:$0xff]  ;;  %s1416_s12 = sshll.u32 %s327_s13, 4  ;;  %s2917_s11 = sld [smem:[#allocation25_spill]]  ;;  %s2804_s12 = int_to_ptr.vmem [resolvable:$true] %s1416_s12 }
 0x360   : > { %1781 = vmatprep.subr.bf16.mxu0 %v1780_v10  ;;  %v1814_v19 = vpack.c.bf16 %v514_v17, %v510_v16  ;;  %v523_v22 = vld [vmem:[#allocation7 + $0x78] sm:$0xff]  ;;  %1813 = vmatprep.subr.bf16.mxu1 %v1812_v14  ;;  %v1784_v23 = vpack.c.bf16 %v521_v20, %v517_v18  ;;  %v516_v25 = vld [vmem:[#allocation7 + $0x40] sm:$0xff]  ;;  %v518_v27 = vld [vmem:[#allocation7 + $0x50] sm:$0xff] }
 0x361   : > { %1783 = vmatpush1.bf16.msra.mxu0 %v1782_v15  ;;  %v1816_v24 = vpack.c.bf16 %v523_v22, %v519_v21  ;;  %v520_v26 = vld [vmem:[#allocation7 + $0x60] sm:$0xff]  ;;  %v522_v29 = vld [vmem:[#allocation7 + $0x70] sm:$0xff]  ;;  %v525_v30 = vld [vmem:[#allocation7 + $0x88] sm:$0xff]  ;;  %v2383_v15 = vmov 0.0  }
 0x362   : > { %1815 = vmatpush1.bf16.msra.mxu1 %v1814_v19  ;;  %v1786_v28 = vpack.c.bf16 %v520_v26, %v516_v25  ;;  %v529_v31 = vld [vmem:[#allocation7 + $0xa8] sm:$0xff]  ;;  %1785 = vmatprep.subr.bf16.mxu0 %v1784_v23  ;;  %v1818_v32 = vpack.c.bf16 %v522_v29, %v518_v27  ;;  %v527_v34 = vld [vmem:[#allocation7 + $0x98] sm:$0xff]  ;;  %v524_v36 = vld [vmem:[#allocation7 + $0x80] sm:$0xff] }
 0x363   : > { %1817 = vmatprep.subr.bf16.mxu1 %v1816_v24  ;;  %v1788_v33 = vpack.c.bf16 %v529_v31, %v525_v30  ;;  %v531_v35 = vld [vmem:[#allocation7 + $0xb8] sm:$0xff]  ;;  %v528_v38 = vld [vmem:[#allocation7 + $0xa0] sm:$0xff]  ;;  %v526_v39 = vld [vmem:[#allocation7 + $0x90] sm:$0xff]  ;;  %636 = vmatprep.mubr.f32.mxu0 %v2383_v15  ;;  %s1568_s5 = sshll.u32 %s2914_s20, 1  ;;  %s2385_s20 = smov [#allocation12]  }
 0x364   : > { %v1820_v37 = vpack.c.bf16 %v531_v35, %v527_v34  ;;  %v530_v40 = vld [vmem:[#allocation7 + $0xb0] sm:$0xff]  ;;  %v1790_v41 = vpack.c.bf16 %v528_v38, %v524_v36  ;;  %v533_v42 = vld [vmem:[#allocation7 + $0xc8] sm:$0xff]  ;;  %v535_v44 = vld [vmem:[#allocation7 + $0xd8] sm:$0xff]  ;;  %707 = vmatprep.mubr.f32.mxu1 %v2383_v15  ;;  %s1412_s2 = sadd.s32 %s2356_s27, %s1568_s5  ;;  %s1401_s27 = scalar_lea.sflag [#allocation6], %s325_s3 }
 0x365   : > { %1787 = vmatpush1.bf16.msra.mxu0 %v1786_v28  ;;  %v537_v43 = vld [vmem:[#allocation7 + $0xe8] sm:$0xff]  ;;  %v1822_v45 = vpack.c.bf16 %v530_v40, %v526_v39  ;;  %v539_v47 = vld [vmem:[#allocation7 + $0xf8] sm:$0xff]  ;;  %v532_v53 = vld [vmem:[#allocation7 + $0xc0] sm:$0xff]  ;;  %s1569_s19 = sshll.u32 %s1412_s2, 7  ;;  %p2918_p3 = scmp.ne.s32.totalorder %s2915_s28, 0 }
 0x366   : > { %1819 = vmatpush1.bf16.msra.mxu1 %v1818_v32  ;;  %1789 = vmatprep.subr.bf16.mxu0 %v1788_v33  ;;  %v1792_v46 = vpack.c.bf16 %v537_v43, %v533_v42  ;;  %v1824_v48 = vpack.c.bf16 %v539_v47, %v535_v44  ;;  %v536_v54 = vld [vmem:[#allocation7 + $0xe0] sm:$0xff]  ;;  %v534_v55 = vld [vmem:[#allocation7 + $0xd0] sm:$0xff]  ;;  %v541_v59 = vld [vmem:[#allocation7 + $0x108] sm:$0xff]  ;;  %v502_v47 = vlaneseq  ;;  %s2802_s21 = scalar_lea.hbm %s2917_s11, %s1569_s19  ;;  %s2246_s5 = sshll.u32 %s2385_s20, 4  ;;  %s2247_s5 = int_to_ptr.vmem [resolvable:$false] %s2246_s5 }
 0x367   : > { %1821 = vmatprep.subr.bf16.mxu1 %v1820_v37  ;;  %v1794_v56 = vpack.c.bf16 %v536_v54, %v532_v53  ;;  %v538_v57 = vld [vmem:[#allocation7 + $0xf0] sm:$0xff]  ;;  %v545_v60 = vld [vmem:[#allocation7 + $0x128] sm:$0xff]  ;;  %v543_v61 = vld [vmem:[#allocation7 + $0x118] sm:$0xff]  ;;  %s2248_s2 = scalar_lea.vmem %s2247_s5, 256  ;;  %p2249_p9 = scmp.lt.s32.totalorder %s2804_s12, %s2247_s5 }
 0x368   : > { %v1826_v58 = vpack.c.bf16 %v538_v57, %v534_v55  ;;  %v1796_v62 = vpack.c.bf16 %v545_v60, %v541_v59  ;;  %v547_v63 = vld [vmem:[#allocation7 + $0x138] sm:$0xff]  ;;  %v540_v1 = vld [vmem:[#allocation7 + $0x100] sm:$0xff]  ;;  %v542_v5 = vld [vmem:[#allocation7 + $0x110] sm:$0xff] }
 0x369   : > { %1791 = vmatpush1.bf16.msra.mxu0 %v1790_v41  ;;  %v544_v2 = vld [vmem:[#allocation7 + $0x120] sm:$0xff]  ;;  %v1828_v3 = vpack.c.bf16 %v547_v63, %v543_v61  ;;  %v549_v8 = vld [vmem:[#allocation7 + $0x148] sm:$0xff]  ;;  %v551_v10 = vld [vmem:[#allocation7 + $0x158] sm:$0xff] }
 0x36a   : > { %1823 = vmatpush1.bf16.msra.mxu1 %v1822_v45  ;;  %1793 = vmatprep.subr.bf16.mxu0 %v1792_v46  ;;  %v1798_v4 = vpack.c.bf16 %v544_v2, %v540_v1  ;;  %v553_v9 = vld [vmem:[#allocation7 + $0x168] sm:$0xff]  ;;  %v555_v12 = vld [vmem:[#allocation7 + $0x178] sm:$0xff]  ;;  %v548_v13 = vld [vmem:[#allocation7 + $0x140] sm:$0xff] }
 0x36b   : > { %1825 = vmatprep.subr.bf16.mxu1 %v1824_v48  ;;  %v1800_v11 = vpack.c.bf16 %v553_v9, %v549_v8  ;;  %v552_v14 = vld [vmem:[#allocation7 + $0x160] sm:$0xff]  ;;  %v1832_v16 = vpack.c.bf16 %v555_v12, %v551_v10  ;;  %v550_v18 = vld [vmem:[#allocation7 + $0x150] sm:$0xff]  ;;  %v557_v20 = vld [vmem:[#allocation7 + $0x188] sm:$0xff] }
 0x36c   : > { %v1802_v17 = vpack.c.bf16 %v552_v14, %v548_v13  ;;  %v554_v19 = vld [vmem:[#allocation7 + $0x170] sm:$0xff]  ;;  %v561_v22 = vld [vmem:[#allocation7 + $0x1a8] sm:$0xff]  ;;  %v559_v23 = vld [vmem:[#allocation7 + $0x198] sm:$0xff] }
 0x36d   : > { %1795 = vmatpush1.bf16.msra.mxu0 %v1794_v56  ;;  %v1834_v21 = vpack.c.bf16 %v554_v19, %v550_v18  ;;  %v563_v24 = vld [vmem:[#allocation7 + $0x1b8] sm:$0xff]  ;;  %v1804_v25 = vpack.c.bf16 %v561_v22, %v557_v20  ;;  %v556_v27 = vld [vmem:[#allocation7 + $0x180] sm:$0xff]  ;;  %v558_v29 = vld [vmem:[#allocation7 + $0x190] sm:$0xff] }
 0x36e   : > { %1827 = vmatpush1.bf16.msra.mxu1 %v1826_v58  ;;  %1797 = vmatprep.subr.bf16.mxu0 %v1796_v62  ;;  %v1836_v26 = vpack.c.bf16 %v563_v24, %v559_v23  ;;  %v560_v28 = vld [vmem:[#allocation7 + $0x1a0] sm:$0xff]  ;;  %v562_v31 = vld [vmem:[#allocation7 + $0x1b0] sm:$0xff]  ;;  %v565_v32 = vld [vmem:[#allocation7 + $0x1c8] sm:$0xff] }
 0x36f   : > { %1829 = vmatprep.subr.bf16.mxu1 %v1828_v3  ;;  %v1806_v30 = vpack.c.bf16 %v560_v28, %v556_v27  ;;  %v569_v33 = vld [vmem:[#allocation7 + $0x1e8] sm:$0xff]  ;;  %v1838_v34 = vpack.c.bf16 %v562_v31, %v558_v29  ;;  %v567_v36 = vld [vmem:[#allocation7 + $0x1d8] sm:$0xff]  ;;  %v564_v38 = vld [vmem:[#allocation7 + $0x1c0] sm:$0xff] }
 0x370   : > { %v1808_v35 = vpack.c.bf16 %v569_v33, %v565_v32  ;;  %v571_v37 = vld [vmem:[#allocation7 + $0x1f8] sm:$0xff]  ;;  %v568_v40 = vld [vmem:[#allocation7 + $0x1e0] sm:$0xff]  ;;  %v566_v41 = vld [vmem:[#allocation7 + $0x1d0] sm:$0xff] }
 0x371   : > { %1799 = vmatpush1.bf16.msra.mxu0 %v1798_v4  ;;  %v1840_v39 = vpack.c.bf16 %v571_v37, %v567_v36  ;;  %v570_v42 = vld [vmem:[#allocation7 + $0x1f0] sm:$0xff]  ;;  %v1810_v43 = vpack.c.bf16 %v568_v40, %v564_v38  ;;  %v799_v19 = vld [vmem:[#allocation2] sm:$0xff]  ;;  %v800_v20 = vld [vmem:[#allocation2 + $0x8] sm:$0xff] }
 0x372   : > { %1801 = vmatprep.subr.bf16.mxu0 %v1800_v11  ;;  %v1842_v44 = vpack.c.bf16 %v570_v42, %v566_v41  ;;  %vm1845_vm2 = vmpackc.low %vm742_vm1, %vm742_vm1 }
 0x375   : > { %1803 = vmatpush1.bf16.msra.mxu0 %v1802_v17 }
 0x376   : > { %1805 = vmatprep.subr.bf16.mxu0 %v1804_v25 }
 0x379   : > { %1807 = vmatpush1.bf16.msra.mxu0 %v1806_v30 }
 0x37a   : > { %1809 = vmatprep.subr.bf16.mxu0 %v1808_v35 }
 0x37d   : > { %1811 = vmatpush1.bf16.msra.mxu0 %v1810_v43 }
 0x3ec   : > { %v490_v49 = vpop.xlane.xlu0 %489 }
 0x3ed   : > { %v492_v50 = vmul.f32 0.0078125, %v490_v49  ;;  %v503_v49 = vshrl.u32 %v502_v47, 7 }
 0x3ef   : > { %v2703_v51 = vsub.f32 %v488_v6, %v492_v50  ;;  %v546_v6 = vld [vmem:[#allocation7 + $0x130] sm:$0xff]  ;;  %v504_v50 = vsub.s32 0, %v503_v49 }
 0x3f0   : > { %v1830_v7 = vpack.c.bf16 %v546_v6, %v542_v5 }
 0x3f1   : > { %v494_v52 = vmul.f32 %v2703_v51, %v2703_v51 }
 0x3f2   : > { %1831 = vmatpush1.bf16.msra.mxu1 %v1830_v7 }
 0x3f3   : > { %495 = vadd.xlane.f32.xlu0 %v494_v52  ;;  %1833 = vmatprep.subr.bf16.mxu1 %v1832_v16  ;;  %v505_v52 = vrot.slane %v2688_v0, %v504_v50 }
 0x3f6   : > { %1835 = vmatpush1.bf16.msra.mxu1 %v1834_v21  ;;  %v1844_v21 = vpack.c.bf16 %v800_v20, %v799_v19 }
 0x3f7   : > { %1837 = vmatprep.subr.bf16.mxu1 %v1836_v26 }
 0x3f8   : > { %1846 = vmatprep.subr.msk.bf16.mxu0 %vm1845_vm2, %v1844_v21 }
 0x3fa   : > { %1839 = vmatpush1.bf16.msra.mxu1 %v1838_v34 }
 0x3fb   : > { %1841 = vmatprep.subr.bf16.mxu1 %v1840_v39 }
 0x3fe   : > { %1843 = vmatpush1.bf16.msra.mxu1 %v1842_v44 }
 0x480   : > { %v496_v45 = vpop.xlane.xlu0 %495 }
 0x481   : > { %v497_v46 = vmul.f32 0.0078125, %v496_v45 }
 0x483   : > { %v498_v48 = vadd.f32 1e-05, %v497_v46 }
 0x485   : > { %2076 = vrsqrt.f32 %v498_v48 }
 0x48f   : > { %v2077_v53 = vpop.eup %2076 }
 0x490   : > { %v500_v54 = vmul.f32 %v2077_v53, %v2703_v51 }
 0x492   : > { %v507_v55 = vmul.f32 %v505_v52, %v500_v54 }
 0x494   : > { %637 = vmatmul.mubr.f32.vlgmr.msra.gmra.mrb[0].mxu0 %v507_v55  ;;  %708 = vmatmul.mubr.f32.vlgmr.msra.gmra.mrb[0].mxu1 %v507_v55 }
 0x495   : > { %1849 = vmatpush3.bf16.xpose.msk.msra.mxu0 %vm1845_vm2, %v1844_v21 }
 0x567   : > { %v638_v56 = vpop.f32.mrb[0].mxu0  ;;  %v709_v57 = vpop.f32.mrb[0].mxu1 }
 0x568   : > { %v714_v58 = vmul.f32 16.0, %v638_v56  ;;  %v2709_v59 = vmul.f32 16.0, %v709_v57  ;;  %v640_v60 = vpop.f32.mrb[1].mxu0  ;;  %v711_v61 = vpop.f32.mrb[1].mxu1 }
 0x569   : > { %v2714_v0 = vmul.f32 16.0, %v640_v60  ;;  %v2718_v51 = vmul.f32 16.0, %v711_v61 }
 0x56a   : > { %727 = vrot.lane.b32.xlu0 %v2709_v59, %s2384_s24  ;;  %719 = vrot.lane.b32.xlu1 %v714_v58, %s2384_s24  ;;  %v734_v62 = vmul.f32 %v714_v58, %v714_v58  ;;  %v738_v3 = vmul.f32 %v2709_v59, %v2709_v59 }
 0x56b   : > { %v736_v1 = vmul.f32 %v2714_v0, %v2714_v0  ;;  %v740_v8 = vmul.f32 %v2718_v51, %v2718_v51 }
 0x56c   : > { %v743_v63 = vsel %vm742_vm1, %v734_v62, 0.0  ;;  %v755_v4 = vsel %vm742_vm1, %v738_v3, 0.0 }
 0x56d   : > { %v749_v2 = vsel %vm742_vm1, %v736_v1, 0.0  ;;  %v761_v13 = vsel %vm742_vm1, %v740_v8, 0.0 }
 0x56e   : > { %723 = vrot.lane.b32.xlu1 %v2714_v0, %s2384_s24 }
 0x572   : > { %731 = vrot.lane.b32.xlu1 %v2718_v51, %s2384_s24 }
 0x596   : > { %744 = vadd.xlane.f32.xlu1 %v743_v63 }
 0x59a   : > { %750 = vadd.xlane.f32.xlu1 %v749_v2 }
 0x59e   : > { %756 = vadd.xlane.f32.xlu1 %v755_v4 }
 0x5dc   : > { %v720_v5 = vpop.permute.xlu1 %719  ;;  %v2732_v9 = vpop.permute.xlu0 %727 }
 0x5dd   : > { %v735_v6 = vmul.f32 %v720_v5, %v720_v5  ;;  %v739_v12 = vmul.f32 %v2732_v9, %v2732_v9 }
 0x5df   : > { %v746_v7 = vsel %vm742_vm1, %v735_v6, 0.0  ;;  %v758_v17 = vsel %vm742_vm1, %v739_v12, 0.0 }
 0x5e0   : > { %747 = vadd.xlane.f32.xlu0 %v746_v7  ;;  %v724_v10 = vpop.permute.xlu1 %723 }
 0x5e1   : > { %v737_v11 = vmul.f32 %v724_v10, %v724_v10 }
 0x5e3   : > { %v752_v14 = vsel %vm742_vm1, %v737_v11, 0.0 }
 0x5e4   : > { %762 = vadd.xlane.f32.xlu0 %v761_v13  ;;  %v2738_v15 = vpop.permute.xlu1 %731  ;;  %753 = vadd.xlane.f32.xlu1 %v752_v14  ;;  %v801_v14 = vld [vmem:[#allocation3] sm:$0xff] }
 0x5e5   : > { %v741_v16 = vmul.f32 %v2738_v15, %v2738_v15 }
 0x5e7   : > { %v764_v18 = vsel %vm742_vm1, %v741_v16, 0.0 }
 0x5e8   : > { %759 = vadd.xlane.f32.xlu1 %v758_v17 }
 0x5ec   : > { %765 = vadd.xlane.f32.xlu1 %v764_v18 }
 0x623   : > { %v745_v22 = vpop.xlane.xlu1 %744 }
 0x624   : > { %v767_v23 = vmax.f32 %v745_v22, 1e-24 }
 0x626   : > { %2078 = vrsqrt.f32 %v767_v23 }
 0x627   : > { %v751_v27 = vpop.xlane.xlu1 %750 }
 0x628   : > { %v769_v28 = vmax.f32 %v751_v27, 1e-24 }
 0x62a   : > { %2080 = vrsqrt.f32 %v769_v28 }
 0x62b   : > { %v757_v29 = vpop.xlane.xlu1 %756 }
 0x62c   : > { %v771_v31 = vmax.f32 %v757_v29, 1e-24 }
 0x630   : > { %v2079_v24 = vpop.eup %2078 }
 0x631   : > { %v783_v25 = vmul.f32 4.0, %v2079_v24 }
 0x633   : > { %v791_v26 = vmul.f32 %v783_v25, %v714_v58 }
 0x634   : > { %v2081_v39 = vpop.eup %2080 }
 0x635   : > { %1720 = vmatprep.mubr.msk.f32.mxu0 %vm742_vm1, %v791_v26  ;;  %v785_v42 = vmul.f32 4.0, %v2081_v39 }
 0x637   : > { %v793_v47 = vmul.f32 %v785_v42, %v2714_v0 }
 0x66d   : > { %v748_v30 = vpop.xlane.xlu0 %747 }
 0x66e   : > { %v768_v32 = vmax.f32 %v748_v30, 1e-24 }
 0x670   : > { %2082 = vrsqrt.f32 %v768_v32 }
 0x671   : > { %v763_v33 = vpop.xlane.xlu0 %762  ;;  %v754_v34 = vpop.xlane.xlu1 %753  ;;  %2084 = vrsqrt.f32 %v771_v31 }
 0x672   : > { %v773_v35 = vmax.f32 %v763_v33, 1e-24  ;;  %v770_v36 = vmax.f32 %v754_v34, 1e-24 }
 0x674   : > { %2086 = vrsqrt.f32 %v770_v36 }
 0x675   : > { %v760_v37 = vpop.xlane.xlu1 %759  ;;  %2088 = vrsqrt.f32 %v773_v35 }
 0x676   : > { %v772_v38 = vmax.f32 %v760_v37, 1e-24 }
 0x678   : > { %2090 = vrsqrt.f32 %v772_v38 }
 0x679   : > { %v766_v40 = vpop.xlane.xlu1 %765 }
 0x67a   : > { %v2083_v41 = vpop.eup %2082  ;;  %v774_v43 = vmax.f32 %v766_v40, 1e-24 }
 0x67b   : > { %v784_v44 = vmul.f32 4.0, %v2083_v41  ;;  %v2085_v45 = vpop.eup %2084 }
 0x67c   : > { %2092 = vrsqrt.f32 %v774_v43  ;;  %v787_v49 = vmul.f32 4.0, %v2085_v45 }
 0x67d   : > { %v792_v46 = vmul.f32 %v784_v44, %v720_v5 }
 0x67e   : > { %v2087_v48 = vpop.eup %2086  ;;  %v795_v55 = vmul.f32 %v787_v49, %v2709_v59 }
 0x67f   : > { %1721 = vmatmul.mubr.msk.f32.vlgmr.msra.gmra.mrb[2].mxu0 %vm742_vm1, %v792_v46  ;;  %v2089_v50 = vpop.eup %2088  ;;  %v786_v52 = vmul.f32 4.0, %v2087_v48 }
 0x680   : > { %1723 = vmatprep.mubr.msk.f32.mxu0 %vm742_vm1, %v793_v47  ;;  %v789_v56 = vmul.f32 4.0, %v2089_v50 }
 0x681   : > { %v794_v54 = vmul.f32 %v786_v52, %v724_v10 }
 0x682   : > { %v2091_v53 = vpop.eup %2090  ;;  %v797_v61 = vmul.f32 %v789_v56, %v2718_v51 }
 0x683   : > { %v788_v57 = vmul.f32 4.0, %v2091_v53  ;;  %1724 = vmatmul.mubr.msk.f32.gmra.mrb[4].mxu0 %vm742_vm1, %v794_v54 }
 0x684   : > { %1726 = vmatprep.mubr.msk.f32.mxu0 %vm742_vm1, %v795_v55 }
 0x685   : > { %v796_v58 = vmul.f32 %v788_v57, %v2732_v9 }
 0x686   : > { %v2093_v60 = vpop.eup %2092 }
 0x687   : > { %v790_v0 = vmul.f32 4.0, %v2093_v60  ;;  %1727 = vmatmul.mubr.msk.f32.gmra.mrb[6].mxu0 %vm742_vm1, %v796_v58  ;;  %v1192_v58 = vld [vmem:[#allocation10 + $0x80] sm:$0xff]  ;;  %v1193_v60 = vld [vmem:[#allocation10 + $0x88] sm:$0xff] }
 0x688   : > { %1729 = vmatprep.mubr.msk.f32.mxu0 %vm742_vm1, %v797_v61  ;;  %v1224_v61 = vld [vmem:[#allocation10 + $0x180] sm:$0xff] }
 0x689   : > { %v798_v62 = vmul.f32 %v790_v0, %v2738_v15  ;;  %v802_v15 = vld [vmem:[#allocation3 + $0x8] sm:$0xff]  ;;  %v1854_v0 = vpack.c.bf16 %v1193_v60, %v1192_v58  ;;  %v1186_v60 = vld [vmem:[#allocation10 + $0x50] sm:$0xff] }
 0x68a   : > { %v1850_v16 = vpack.c.bf16 %v802_v15, %v801_v14  ;;  %v1211_v15 = vld [vmem:[#allocation10 + $0x118] sm:$0xff] }
 0x68b   : > { %1730 = vmatmul.mubr.msk.f32.gmra.mrb[8].mxu0 %vm742_vm1, %v798_v62  ;;  %v1225_v62 = vld [vmem:[#allocation10 + $0x188] sm:$0xff] }
 0x68c   : > { %1851 = vmatprep.subr.bf16.mxu1 %v1850_v16 }
 0x68d   : > { %1853 = vmatpush3.bf16.msra.mxu1 %v1850_v16  ;;  %v1196_v16 = vld [vmem:[#allocation10 + $0xa0] sm:$0xff] }
 0x68e   : > { %1855 = vmatprep.subr.bf16.mxu1 %v1854_v0 }
 0x752   : > { %v1722_v59 = vpop.f32.mrb[2].mxu0 }
 0x753   : > { %v899_v63 = vpop.f32.mrb[3].mxu0  ;;  %v942_v1 = vsel %vm938_vm3, %v1722_v59, -inf }
 0x754   : > { %943 = vmax.xlane.f32.xlu1 %v942_v1  ;;  %v939_v2 = vsel %vm938_vm3, %v899_v63, -inf  ;;  %v1886_v1 = vpack.c.bf16 %v1225_v62, %v1224_v61  ;;  %v1187_v61 = vld [vmem:[#allocation10 + $0x58] sm:$0xff]  ;;  %v1218_v62 = vld [vmem:[#allocation10 + $0x150] sm:$0xff] }
 0x755   : > { %940 = vmax.xlane.f32.xlu0 %v939_v2 }
 0x756   : > { %v1725_v3 = vpop.f32.mrb[4].mxu0  ;;  %1887 = vmatprep.subr.bf16.mxu0 %v1886_v1 }
 0x757   : > { %v909_v51 = vpop.f32.mrb[5].mxu0  ;;  %v948_v4 = vsel %vm938_vm3, %v1725_v3, -inf }
 0x758   : > { %949 = vmax.xlane.f32.xlu1 %v948_v4  ;;  %v945_v5 = vsel %vm938_vm3, %v909_v51, -inf  ;;  %v1194_v4 = vld [vmem:[#allocation10 + $0x90] sm:$0xff] }
 0x759   : > { %946 = vmax.xlane.f32.xlu0 %v945_v5 }
 0x75a   : > { %v1728_v6 = vpop.f32.mrb[6].mxu0 }
 0x75b   : > { %v919_v7 = vpop.f32.mrb[7].mxu0  ;;  %v954_v8 = vsel %vm938_vm3, %v1728_v6, -inf }
 0x75c   : > { %955 = vmax.xlane.f32.xlu1 %v954_v8  ;;  %v951_v9 = vsel %vm938_vm3, %v919_v7, -inf  ;;  %v1227_v8 = vld [vmem:[#allocation10 + $0x198] sm:$0xff] }
 0x75d   : > { %952 = vmax.xlane.f32.xlu0 %v951_v9 }
 0x75e   : > { %v1731_v10 = vpop.f32.mrb[8].mxu0 }
 0x75f   : > { %v929_v11 = vpop.f32.mrb[9].mxu0  ;;  %v960_v12 = vsel %vm938_vm3, %v1731_v10, -inf }
 0x760   : > { %961 = vmax.xlane.f32.xlu1 %v960_v12  ;;  %v957_v13 = vsel %vm938_vm3, %v929_v11, -inf  ;;  %v1179_v12 = vld [vmem:[#allocation10 + $0x18] sm:$0xff] }
 0x761   : > { %958 = vmax.xlane.f32.xlu0 %v957_v13  ;;  %v1210_v13 = vld [vmem:[#allocation10 + $0x110] sm:$0xff] }
 0x7e1   : > { %v944_v17 = vpop.xlane.xlu1 %943 }
 0x7e2   : > { %v964_v18 = vsub.f32 %v1722_v59, %v944_v17  ;;  %v941_v19 = vpop.xlane.xlu0 %940  ;;  %v1176_v59 = vld [vmem:[#allocation10] sm:$0xff]  ;;  %v1197_v17 = vld [vmem:[#allocation10 + $0xa8] sm:$0xff] }
 0x7e3   : > { %v963_v20 = vsub.f32 %v899_v63, %v941_v19  ;;  %v1177_v63 = vld [vmem:[#allocation10 + $0x8] sm:$0xff]  ;;  %v1862_v19 = vpack.c.bf16 %v1197_v17, %v1196_v16  ;;  %v1220_v16 = vld [vmem:[#allocation10 + $0x160] sm:$0xff] }
 0x7e4   : > { %v973_v21 = vmul.f32 1.442695, %v964_v18  ;;  %v1856_v2 = vpack.c.bf16 %v1177_v63, %v1176_v59  ;;  %v1892_v18 = vpack.c.bf16 %v1211_v15, %v1210_v13  ;;  %v1219_v59 = vld [vmem:[#allocation10 + $0x158] sm:$0xff]  ;;  %v1876_v63 = vpack.c.bf16 %v1187_v61, %v1186_v60  ;;  %v1221_v17 = vld [vmem:[#allocation10 + $0x168] sm:$0xff] }
 0x7e5   : > { %v971_v22 = vmul.f32 1.442695, %v963_v20  ;;  %v950_v23 = vpop.xlane.xlu1 %949  ;;  %v1228_v20 = vld [vmem:[#allocation10 + $0x1a0] sm:$0xff]  ;;  %v1908_v1 = vpack.c.bf16 %v1219_v59, %v1218_v62 }
 0x7e6   : > { %v966_v24 = vsub.f32 %v1725_v3, %v950_v23  ;;  %v947_v25 = vpop.xlane.xlu0 %946  ;;  %v1208_v3 = vld [vmem:[#allocation10 + $0x100] sm:$0xff] }
 0x7e7   : > { %2094 = vpow2.f32 %v971_v22  ;;  %v965_v26 = vsub.f32 %v909_v51, %v947_v25  ;;  %v1209_v51 = vld [vmem:[#allocation10 + $0x108] sm:$0xff]  ;;  %v1180_v22 = vld [vmem:[#allocation10 + $0x20] sm:$0xff] }
 0x7e8   : > { %2096 = vpow2.f32 %v973_v21  ;;  %v977_v27 = vmul.f32 1.442695, %v966_v24  ;;  %v1888_v5 = vpack.c.bf16 %v1209_v51, %v1208_v3  ;;  %v1229_v21 = vld [vmem:[#allocation10 + $0x1a8] sm:$0xff]  ;;  %v1212_v25 = vld [vmem:[#allocation10 + $0x120] sm:$0xff] }
 0x7e9   : > { %v975_v28 = vmul.f32 1.442695, %v965_v26  ;;  %v956_v29 = vpop.xlane.xlu1 %955  ;;  %v1894_v23 = vpack.c.bf16 %v1229_v21, %v1228_v20  ;;  %v1181_v24 = vld [vmem:[#allocation10 + $0x28] sm:$0xff]  ;;  %v1207_v20 = vld [vmem:[#allocation10 + $0xf8] sm:$0xff]  ;;  %v1238_v21 = vld [vmem:[#allocation10 + $0x1f0] sm:$0xff] }
 0x7ea   : > { %2098 = vpow2.f32 %v977_v27  ;;  %v968_v30 = vsub.f32 %v1728_v6, %v956_v29  ;;  %v953_v31 = vpop.xlane.xlu0 %952  ;;  %v1195_v6 = vld [vmem:[#allocation10 + $0x98] sm:$0xff]  ;;  %1889 = vmatpush3.bf16.msra.mxu0 %v1888_v5  ;;  %v1213_v26 = vld [vmem:[#allocation10 + $0x128] sm:$0xff]  ;;  %v1864_v27 = vpack.c.bf16 %v1181_v24, %v1180_v22  ;;  %v1204_v5 = vld [vmem:[#allocation10 + $0xe0] sm:$0xff] }
 0x7eb   : > { %2100 = vpow2.f32 %v975_v28  ;;  %v967_v32 = vsub.f32 %v919_v7, %v953_v31  ;;  %v1226_v7 = vld [vmem:[#allocation10 + $0x190] sm:$0xff]  ;;  %v1858_v9 = vpack.c.bf16 %v1195_v6, %v1194_v4  ;;  %v1199_v29 = vld [vmem:[#allocation10 + $0xb8] sm:$0xff]  ;;  %v1896_v31 = vpack.c.bf16 %v1213_v26, %v1212_v25  ;;  %v1205_v6 = vld [vmem:[#allocation10 + $0xe8] sm:$0xff] }
 0x7ec   : > { %v981_v33 = vmul.f32 1.442695, %v968_v30  ;;  %v1198_v28 = vld [vmem:[#allocation10 + $0xb0] sm:$0xff]  ;;  %v1191_v25 = vld [vmem:[#allocation10 + $0x78] sm:$0xff] }
 0x7ed   : > { %v979_v34 = vmul.f32 1.442695, %v967_v32  ;;  %v962_v35 = vpop.xlane.xlu1 %961  ;;  %v1230_v30 = vld [vmem:[#allocation10 + $0x1b0] sm:$0xff]  ;;  %v1866_v32 = vpack.c.bf16 %v1199_v29, %v1198_v28 }
 0x7ee   : > { %v970_v36 = vsub.f32 %v1731_v10, %v962_v35  ;;  %v959_v37 = vpop.xlane.xlu0 %958  ;;  %v1890_v10 = vpack.c.bf16 %v1227_v8, %v1226_v7  ;;  %v1183_v35 = vld [vmem:[#allocation10 + $0x38] sm:$0xff]  ;;  %v1236_v7 = vld [vmem:[#allocation10 + $0x1e0] sm:$0xff]  ;;  %v1190_v24 = vld [vmem:[#allocation10 + $0x70] sm:$0xff] }
 0x7ef   : > { %2102 = vpow2.f32 %v979_v34  ;;  %v969_v38 = vsub.f32 %v929_v11, %v959_v37  ;;  %v1178_v11 = vld [vmem:[#allocation10 + $0x10] sm:$0xff]  ;;  %v1884_v28 = vpack.c.bf16 %v1191_v25, %v1190_v24 }
 0x7f0   : > { %2104 = vpow2.f32 %v981_v33  ;;  %v985_v40 = vmul.f32 1.442695, %v970_v36  ;;  %v1860_v14 = vpack.c.bf16 %v1179_v12, %v1178_v11  ;;  %1891 = vmatprep.subr.bf16.mxu0 %v1890_v10  ;;  %v1231_v33 = vld [vmem:[#allocation10 + $0x1b8] sm:$0xff]  ;;  %v1182_v34 = vld [vmem:[#allocation10 + $0x30] sm:$0xff]  ;;  %v1237_v10 = vld [vmem:[#allocation10 + $0x1e8] sm:$0xff] }
 0x7f1   : > { %v2095_v39 = vpop.eup %2094  ;;  %v983_v42 = vmul.f32 1.442695, %v969_v38  ;;  %1893 = vmatpush3.bf16.msra.mxu0 %v1892_v18  ;;  %v1898_v36 = vpack.c.bf16 %v1231_v33, %v1230_v30  ;;  %v1214_v37 = vld [vmem:[#allocation10 + $0x130] sm:$0xff]  ;;  %v1215_v38 = vld [vmem:[#allocation10 + $0x138] sm:$0xff]  ;;  %v1188_v11 = vld [vmem:[#allocation10 + $0x60] sm:$0xff]  ;;  %v1912_v18 = vpack.c.bf16 %v1221_v17, %v1220_v16 }
 0x7f2   : > { %v2097_v41 = vpop.eup %2096  ;;  %1736 = vmatprep.mubr.msk.f32.mxu1 %vm938_vm3, %v2095_v39  ;;  %2106 = vpow2.f32 %v985_v40  ;;  %v987_v54 = vsel %vm938_vm3, %v2095_v39, 0.0  ;;  %1895 = vmatprep.subr.bf16.mxu0 %v1894_v23  ;;  %v1200_v39 = vld [vmem:[#allocation10 + $0xc0] sm:$0xff]  ;;  %v1201_v40 = vld [vmem:[#allocation10 + $0xc8] sm:$0xff]  ;;  %v1239_v23 = vld [vmem:[#allocation10 + $0x1f8] sm:$0xff] }
 0x7f3   : > { %1737 = vmatmul.mubr.msk.f32.vlgmr.msra.gmra.mrb[2].mxu1 %vm938_vm3, %v2097_v41  ;;  %2108 = vpow2.f32 %v983_v42  ;;  %v990_v47 = vsel %vm938_vm3, %v2097_v41, 0.0  ;;  %v1232_v41 = vld [vmem:[#allocation10 + $0x1c0] sm:$0xff]  ;;  %v1233_v42 = vld [vmem:[#allocation10 + $0x1c8] sm:$0xff]  ;;  %v1222_v29 = vld [vmem:[#allocation10 + $0x170] sm:$0xff] }
 0x7f4   : > { %v2099_v43 = vpop.eup %2098  ;;  %1857 = vmatpush3.bf16.msra.mxu1 %v1856_v2  ;;  %v1189_v12 = vld [vmem:[#allocation10 + $0x68] sm:$0xff]  ;;  %v1223_v30 = vld [vmem:[#allocation10 + $0x178] sm:$0xff] }
 0x7f5   : > { %v2101_v44 = vpop.eup %2100  ;;  %v996_v45 = vsel %vm938_vm3, %v2099_v43, 0.0  ;;  %1859 = vmatprep.subr.bf16.mxu1 %v1858_v9  ;;  %1897 = vmatpush3.bf16.msra.mxu0 %v1896_v31  ;;  %v1878_v9 = vpack.c.bf16 %v1205_v6, %v1204_v5  ;;  %v1880_v15 = vpack.c.bf16 %v1189_v12, %v1188_v11 }
 0x7f6   : > { %1739 = vmatprep.mubr.msk.f32.mxu1 %vm938_vm3, %v2101_v44  ;;  %997 = vadd.xlane.f32.xlu0 %v996_v45  ;;  %v993_v52 = vsel %vm938_vm3, %v2101_v44, 0.0  ;;  %v1900_v44 = vpack.c.bf16 %v1215_v38, %v1214_v37  ;;  %v1870_v45 = vpack.c.bf16 %v1201_v40, %v1200_v39 }
 0x7f7   : > { %1740 = vmatmul.mubr.msk.f32.gmra.mrb[4].mxu1 %vm938_vm3, %v2099_v43  ;;  %v1868_v43 = vpack.c.bf16 %v1183_v35, %v1182_v34  ;;  %1899 = vmatprep.subr.bf16.mxu0 %v1898_v36 }
 0x7f8   : > { %1861 = vmatpush3.bf16.msra.mxu1 %v1860_v14  ;;  %v1910_v14 = vpack.c.bf16 %v1237_v10, %v1236_v7 }
 0x7f9   : > { %v2103_v46 = vpop.eup %2102  ;;  %1863 = vmatprep.subr.bf16.mxu1 %v1862_v19  ;;  %1901 = vmatpush3.bf16.msra.mxu0 %v1900_v44  ;;  %v1206_v19 = vld [vmem:[#allocation10 + $0xf0] sm:$0xff] }
 0x7fa   : > { %v2105_v48 = vpop.eup %2104  ;;  %1742 = vmatprep.mubr.msk.f32.mxu1 %vm938_vm3, %v2103_v46  ;;  %991 = vadd.xlane.f32.xlu0 %v990_v47  ;;  %v999_v56 = vsel %vm938_vm3, %v2103_v46, 0.0  ;;  %v1184_v46 = vld [vmem:[#allocation10 + $0x40] sm:$0xff]  ;;  %v1185_v47 = vld [vmem:[#allocation10 + $0x48] sm:$0xff]  ;;  %v1882_v22 = vpack.c.bf16 %v1207_v20, %v1206_v19 }
 0x7fb   : > { %1743 = vmatmul.mubr.msk.f32.gmra.mrb[6].mxu1 %vm938_vm3, %v2105_v48  ;;  %v1002_v55 = vsel %vm938_vm3, %v2105_v48, 0.0  ;;  %v1216_v48 = vld [vmem:[#allocation10 + $0x140] sm:$0xff] }
 0x7fc   : > { %v2107_v49 = vpop.eup %2106  ;;  %1865 = vmatpush3.bf16.msra.mxu1 %v1864_v27  ;;  %v1914_v27 = vpack.c.bf16 %v1239_v23, %v1238_v21  ;;  %v1566_v20 = vld [vmem:[%s2916_s9] ss:$0 sm:$0xff] }
 0x7fd   : > { %v2109_v50 = vpop.eup %2108  ;;  %v1008_v53 = vsel %vm938_vm3, %v2107_v49, 0.0  ;;  %1867 = vmatprep.subr.bf16.mxu1 %v1866_v32  ;;  %v1916_v32 = vpack.c.bf16 %v1223_v30, %v1222_v29 }
 0x7fe   : > { %994 = vadd.xlane.f32.xlu0 %v993_v52  ;;  %1745 = vmatprep.mubr.msk.f32.mxu1 %vm938_vm3, %v2109_v50  ;;  %v1005_v57 = vsel %vm938_vm3, %v2109_v50, 0.0  ;;  %v1217_v50 = vld [vmem:[#allocation10 + $0x148] sm:$0xff]  ;;  %v1202_v52 = vld [vmem:[#allocation10 + $0xd0] sm:$0xff] }
 0x7ff   : > { %1009 = vadd.xlane.f32.xlu1 %v1008_v53  ;;  %1746 = vmatmul.mubr.msk.f32.gmra.mrb[8].mxu1 %vm938_vm3, %v2107_v49  ;;  %v1902_v49 = vpack.c.bf16 %v1233_v42, %v1232_v41  ;;  %v1203_v53 = vld [vmem:[#allocation10 + $0xd8] sm:$0xff] }
 0x800   : > { %1869 = vmatpush3.bf16.msra.mxu1 %v1868_v43  ;;  %v1874_v58 = vpack.c.bf16 %v1203_v53, %v1202_v52 }
 0x801   : > { %1871 = vmatprep.subr.bf16.mxu1 %v1870_v45  ;;  %1903 = vmatprep.subr.bf16.mxu0 %v1902_v49 }
 0x802   : > { %988 = vadd.xlane.f32.xlu0 %v987_v54  ;;  %v1234_v54 = vld [vmem:[#allocation10 + $0x1d0] sm:$0xff] }
 0x803   : > { %1003 = vadd.xlane.f32.xlu1 %v1002_v55  ;;  %v1235_v55 = vld [vmem:[#allocation10 + $0x1d8] sm:$0xff] }
 0x804   : > { %v1906_v0 = vpack.c.bf16 %v1235_v55, %v1234_v54 }
 0x807   : > { %1000 = vadd.xlane.f32.xlu1 %v999_v56  ;;  %v1872_v56 = vpack.c.bf16 %v1185_v47, %v1184_v46 }
 0x809   : > { %1873 = vmatpush3.bf16.msra.mxu1 %v1872_v56 }
 0x80a   : > { %1875 = vmatprep.subr.bf16.mxu1 %v1874_v58 }
 0x80b   : > { %1006 = vadd.xlane.f32.xlu1 %v1005_v57  ;;  %v1904_v57 = vpack.c.bf16 %v1217_v50, %v1216_v48 }
 0x80d   : > { %1905 = vmatpush3.bf16.msra.mxu0 %v1904_v57  ;;  %1877 = vmatpush3.bf16.msra.mxu1 %v1876_v63 }
 0x80e   : > { %1907 = vmatprep.subr.bf16.mxu0 %v1906_v0  ;;  %1879 = vmatprep.subr.bf16.mxu1 %v1878_v9 }
 0x811   : > { %1909 = vmatpush3.bf16.msra.mxu0 %v1908_v1  ;;  %1881 = vmatpush3.bf16.msra.mxu1 %v1880_v15 }
 0x812   : > { %1911 = vmatprep.subr.bf16.mxu0 %v1910_v14  ;;  %1883 = vmatprep.subr.bf16.mxu1 %v1882_v22 }
 0x815   : > { %1913 = vmatpush3.bf16.msra.mxu0 %v1912_v18  ;;  %1885 = vmatpush3.bf16.msra.mxu1 %v1884_v28 }
 0x816   : > { %1915 = vmatprep.subr.bf16.mxu0 %v1914_v27 }
 0x819   : > { %1917 = vmatpush3.bf16.msra.mxu0 %v1916_v32 }
 0x883   : > { %v998_v2 = vpop.xlane.xlu0 %997 }
 0x887   : > { %v992_v51 = vpop.xlane.xlu0 %991 }
 0x888   : > { %2110 = vrcp.f32 %v992_v51 }
 0x88b   : > { %v995_v47 = vpop.xlane.xlu0 %994 }
 0x88c   : > { %v1010_v3 = vpop.xlane.xlu1 %1009 }
 0x88f   : > { %v989_v49 = vpop.xlane.xlu0 %988 }
 0x890   : > { %v1004_v4 = vpop.xlane.xlu1 %1003 }
 0x891   : > { %2112 = vrcp.f32 %v1004_v4 }
 0x892   : > { %2114 = vrcp.f32 %v998_v2  ;;  %v2111_v33 = vpop.eup %2110 }
 0x893   : > { %2116 = vrcp.f32 %v1010_v3 }
 0x894   : > { %v1001_v48 = vpop.xlane.xlu1 %1000  ;;  %2118 = vrcp.f32 %v995_v47 }
 0x895   : > { %2120 = vrcp.f32 %v989_v49 }
 0x898   : > { %v1007_v50 = vpop.xlane.xlu1 %1006 }
 0x899   : > { %2122 = vrcp.f32 %v1007_v50 }
 0x89a   : > { %2124 = vrcp.f32 %v1001_v48 }
 0x89b   : > { %v2113_v34 = vpop.eup %2112 }
 0x89c   : > { %v2115_v39 = vpop.eup %2114 }
 0x89d   : > { %v2117_v41 = vpop.eup %2116 }
 0x89e   : > { %v2119_v53 = vpop.eup %2118 }
 0x89f   : > { %v2121_v54 = vpop.eup %2120 }
 0x8a3   : > { %v2123_v55 = vpop.eup %2122 }
 0x8a4   : > { %v2125_v60 = vpop.eup %2124 }
 0x8c6   : > { %v1738_v8 = vpop.f32.mrb[2].mxu1 }
 0x8c7   : > { %v2783_v13 = vpop.f32.mrb[3].mxu1  ;;  %v1149_v36 = vmul.f32 %v2111_v33, %v1738_v8 }
 0x8c8   : > { %v1148_v63 = vmul.f32 %v2121_v54, %v2783_v13 }
 0x8ca   : > { %v1741_v26 = vpop.f32.mrb[4].mxu1 }
 0x8cb   : > { %v1111_v31 = vpop.f32.mrb[5].mxu1  ;;  %v1151_v43 = vmul.f32 %v2115_v39, %v1741_v26 }
 0x8cc   : > { %v1150_v61 = vmul.f32 %v2119_v53, %v1111_v31 }
 0x8ce   : > { %v1744_v35 = vpop.f32.mrb[6].mxu1 }
 0x8cf   : > { %v1153_v37 = vmul.f32 %v2113_v34, %v1744_v35  ;;  %v1121_v38 = vpop.f32.mrb[7].mxu1 }
 0x8d0   : > { %v1152_v1 = vmul.f32 %v2125_v60, %v1121_v38 }
 0x8d1   : > { %v2071_v40 = vpack.i.bf16 %v1153_v37, %v1149_v36 }
 0x8d2   : > { %v1747_v42 = vpop.f32.mrb[8].mxu1 }
 0x8d3   : > { %v1155_v44 = vmul.f32 %v2117_v41, %v1747_v42  ;;  %v1131_v45 = vpop.f32.mrb[9].mxu1  ;;  %2072 = vrot.lane.b32.xlu1 %v2071_v40, %s2384_s24 }
 0x8d4   : > { %v1154_v0 = vmul.f32 %v2123_v55, %v1131_v45 }
 0x8d5   : > { %v2066_v46 = vpack.i.bf16 %v1155_v44, %v1151_v43 }
 0x8d7   : > { %2067 = vrot.lane.b32.xlu0 %v2066_v46, %s2384_s24  ;;  %s2242_s24 = scalar_lea.vmem %s2804_s12, 128 }
 0x8d8   : > { %p2243_p1 = scmp.ne.s32.totalorder %s2804_s12, %s2242_s24  ;;  %p2250_p11 = scmp.lt.s32.totalorder %s2248_s2, %s2242_s24 }
 0x8da   : > { %p2244_p7 = pnand %p2243_p1, %p2918_p3  ;;  %p2251_p5 = por %p2250_p11, %p2249_p9 }
 0x8dc   : > { %p2245_p13 = pneg %p2244_p7 }
 0x8de   : > { %p2252_p8 = pnand %p2251_p5, %p2245_p13 }
 0x945   : > { %v2073_v52 = vpop.permute.xlu1 %2072 }
 0x946   : > { %v2075_v56 = vunpack.i.h.bf16 %v2073_v52  ;;  %v2074_v57 = vunpack.i.l.bf16 %v2073_v52 }
 0x948   : > { %v1172_v51 = vsel %vm742_vm1, %v1148_v63, %v2074_v57  ;;  %v1174_v4 = vsel %vm742_vm1, %v1152_v1, %v2075_v56 }
 0x949   : > { %v2068_v58 = vpop.permute.xlu0 %2067 }
 0x94a   : > { %v2070_v62 = vunpack.i.h.bf16 %v2068_v58  ;;  %v2069_v59 = vunpack.i.l.bf16 %v2068_v58 }
 0x94c   : > { %v1173_v2 = vsel %vm742_vm1, %v1150_v61, %v2069_v59  ;;  %v1175_v3 = vsel %vm742_vm1, %v1154_v0, %v2070_v62 }
 0x94d   : > { %1304 = vmatprep.mubr.f32.mxu1 %v1173_v2  ;;  %1374 = vmatprep.mubr.f32.mxu0 %v1175_v3 }
 0x94e   : > { %1305 = vmatmul.mubr.f32.vlgmr.msra.gmra.mrb[10].mxu1 %v1172_v51  ;;  %1375 = vmatmul.mubr.f32.vlgmr.msra.gmra.mrb[10].mxu0 %v1174_v4 }
 0xa21   : > { %v1643_v5 = vpop.f32.mrb[10].mxu1  ;;  %v1678_v6 = vpop.f32.mrb[10].mxu0 }
 0xa22   : > { %v1644_v7 = vpop.f32.mrb[11].mxu1  ;;  %v1679_v8 = vpop.f32.mrb[11].mxu0 }
 0xa23   : > { %v1645_v9 = vadd.f32 %v1644_v7, %v1643_v5  ;;  %v1680_v10 = vadd.f32 %v1679_v8, %v1678_v6 }
 0xa25   : > { %v1377_v11 = vadd.f32 %v1680_v10, %v1645_v9 }
 0xa27   : > { %1381 = vadd.xlane.f32.xlu1 %v1377_v11 }
 0xab4   : > { %v1382_v12 = vpop.xlane.xlu1 %1381 }
 0xab5   : > { %v1383_v13 = vmul.f32 0.0078125, %v1382_v12 }
 0xab7   : > { %v1384_v14 = vsub.f32 %v1377_v11, %v1383_v13 }
 0xab9   : > { %v1385_v15 = vmul.f32 %v1384_v14, %v1384_v14 }
 0xabb   : > { %1386 = vadd.xlane.f32.xlu0 %v1385_v15 }
 0xb48   : > { %v1387_v16 = vpop.xlane.xlu0 %1386 }
 0xb49   : > { %v1388_v17 = vmul.f32 0.0078125, %v1387_v16 }
 0xb4b   : > { %v1389_v18 = vadd.f32 1e-05, %v1388_v17 }
 0xb4d   : > { %2126 = vrsqrt.f32 %v1389_v18 }
 0xb57   : > { %v2127_v19 = vpop.eup %2126 }
 0xb58   : > { %v1391_v21 = vmul.f32 %v2127_v19, %v1384_v14 }
 0xb5a   : > { %v1398_v22 = vmul.f32 %v1566_v20, %v1391_v21 }
 0xb5c   : > { %1399 = vst [vmem:[%s327_s13] sm:$0xff] %v1398_v22 }
 0xb5d   : > { %2255 = shalt.err (!%p2252_p8)
}
 0xb5e   : > { %s2256_s3 = scalar_lea.hbm %s2802_s21, 128  ;;  %s2260_s8 = scalar_lea.hbm %s2917_s11, 512 }
 0xb5f   : > { %p2257_p12 = scmp.ne.s32.totalorder %s2802_s21, %s2256_s3  ;;  %p2261_p10 = scmp.lt.u32.totalorder %s2802_s21, %s2917_s11 }
 0xb60   : > { %p2262_p0 = scmp.lt.u32.totalorder %s2260_s8, %s2256_s3  ;;  %p2264_p1 = scmp.lt.u32.totalorder %s2256_s3, %s2802_s21 }
 0xb61   : > { %p2258_p2 = pnand %p2257_p12, %p2918_p3 }
 0xb62   : > { %p2263_p4 = por %p2262_p0, %p2261_p10 }
 0xb63   : > { %p2259_p6 = pneg %p2258_p2 }
 0xb64   : > { %p2265_p7 = por %p2264_p1, %p2263_p4 }
 0xb66   : > { %p2266_p13 = pnand %p2265_p7, %p2259_p6 }
 0xb68   : > { %2269 = shalt.err (!%p2266_p13)
}
 0xb69   : > { %1932 = dma.vmem_to_hbm [thread:$0]  (%p2918_p3), %s2804_s12, 128, %s2802_s21, %s1401_s27  }
 0xb6a PF: > { %s2919_s19 = sld [smem:[#allocation17_spill]]  ;;  %s2920_s6 = sld [smem:[#allocation20_spill]] }
 0xb6b   : > { %p1959_p9 = scmp.ge.s32.totalorder %s2372_s7, 2 }
 0xb70   : > { %s1428_s10 = sand.u32 1, %s2919_s19   ;;  %p2921_p11 = scmp.ne.s32.totalorder %s2920_s6, 0 }
 0xb71   : > { %s1429_s24 = scalar_lea.sflag [#allocation6], %s1428_s10 }
 0xb72   : > { %p1949_p5 = pnand %p1959_p9, %p2921_p11 }
 0xb74   : > { %2327 = dma.done.wait (!%p1949_p5), %s1429_s24, 128  }
 0xb75   : > { %2329 = vsyncadd (!%p1949_p5), %s1429_s24, 4294967168  ;;  %s24_s7 = sadd.s32 1, %s2372_s7   ;;  %s2922_s21 = smov %s2336_s22 }
 0xb76   : > { %p21_p8 = scmp.ge.s32.totalorder %s24_s7, 6   ;;  %s2923_s22 = smov %s2340_s23 }
 0xb77   : > { %s2924_s23 = smov %s2615_s1  ;;  %s2925_s24 = smov %s2348_s25 }
 0xb78   : > { %s2926_s25 = smov %s2352_s26  ;;  %s2927_s26 = smov %s2610_s17 }
 0xb79   : > { %s2928_s27 = smov %s2364_s29  ;;  %s2929_s28 = smov %s2368_s30 }
 0xb7a   : > { %s2930_s29 = smov %s2933_s16  ;;  %s2931_s30 = smov %s2937_s18 }
 0xb7b   :  { %23 = sbr.rel (!%p21_p8) target bundleno = 17 (0x11), region = 106 }
 0xb82   :  { %1434 = vsyncpa [#allocation5], 1 }
 0xb83   :  { %1436 = vsyncpa [#allocation5 + $0x1], 1 }
 0xb84   :  { %1437 = vsyncpa [#allocation8], 1 }
 0xb85   :  { %1438 = vsyncpa [#allocation11], 1 }
 0xb86   :  { %1439 = vsyncpa [#allocation6], 1 }
 0xb87   :  { %1441 = vsyncpa [#allocation6 + $0x1], 1 }

</bundles_post_ra>
